<compile_context>
chip_gen: v7x
topology: tpu7x:2x2x1
jax: 0.10.0
libtpu: 0.0.40
codegen_flags: <defaults>
</compile_context>

<pallas_src>
import functools

import jax
import jax.numpy as jnp
from jax.experimental import pallas as pl
from jax.experimental.pallas import tpu as pltpu

# Deterministic "parameters" (requires_grad=False buffers in the module).
SOBEL_X = ((-1.0, 0.0, 1.0),
           (-2.0, 0.0, 2.0),
           (-1.0, 0.0, 1.0))
SOBEL_Y = ((-1.0, -2.0, -1.0),
           (0.0, 0.0, 0.0),
           (1.0, 2.0, 1.0))

_LANE = 128


def _sobel_loss_kernel(pred_ref, true_ref, out_ref, *, H, W):
    """pred_ref/true_ref: (H+2, W+2, tb) zero-padded diff images (batch on lanes).

    out_ref: (1, W, tb) partial sum of squared sobel-x + sobel-y responses,
    reduced over the H axis only (cheap VALU adds); the scalar reduction is
    deferred to the wrapper.
    """
    # Single difference image (linearity of the convolution).
    d = pred_ref[...] - true_ref[...]                 # (H+2, W+2, tb) f32

    # Vertical (separable) pass: leading-dim slices are free.
    top = d[0:H, :, :]
    mid = d[1:H + 1, :, :]
    bot = d[2:H + 2, :, :]
    vs = top + 2.0 * mid + bot                        # vertical smooth (H, W+2, tb)
    vd = bot - top                                    # vertical diff   (H, W+2, tb)

    # Horizontal pass: static sublane-dim slices (offsets 0/1/2).
    sx = vs[:, 2:, :] - vs[:, :-2, :]                 # sobel_x(pred-true) (H, W, tb)
    sy = vd[:, :-2, :] + 2.0 * vd[:, 1:-1, :] + vd[:, 2:, :]   # sobel_y     (H, W, tb)

    # Reduce only over the (free) leading H axis; keep the (W, tb) slab
    # lane-dense for an unmasked store.  Final scalar reduce is in the wrapper.
    out_ref[...] = jnp.sum(sx * sx + sy * sy, axis=0, keepdims=True)


def sobel_loss(pred, true, *, batch_tile=512):
    """pred, true: (N, 1, H, W) float32. Returns scalar loss_x + loss_y."""
    N, C, H, W = pred.shape
    assert C == 1, "SobelLoss uses a (1,1,3,3) filter -> single input channel"

    # Batch padded to a lane-friendly multiple of 128; tile `tb` images / step.
    nb_lane = pl.cdiv(N, _LANE) * _LANE
    tb = min(batch_tile, nb_lane)
    assert tb % _LANE == 0
    grid = pl.cdiv(nb_lane, tb)
    nb = grid * tb

    def prep(x):
        # Layout plumbing (single XLA copy): squeeze channel, put batch on the
        # lane (last) axis, fold in the conv padding=1 border and the batch pad.
        # Batch-pad entries are zero in BOTH inputs -> zero diff -> zero loss.
        # If bf16 inputs are available upstream, they could be passed as bf16
        # and cast inside the kernel to halve HBM reads (v6e/v7x).
        x = x.reshape(N, H, W).astype(jnp.float32)
        x = jnp.moveaxis(x, 0, -1)                        # (H, W, N)
        return jnp.pad(x, ((1, 1), (1, 1), (0, nb - N)))  # (H+2, W+2, nb)

    p = prep(pred)
    t = prep(true)

    kern = functools.partial(_sobel_loss_kernel, H=H, W=W)
    partials = pl.pallas_call(
        kern,
        out_shape=jax.ShapeDtypeStruct((grid, W, tb), jnp.float32),
        grid_spec=pltpu.PrefetchScalarGridSpec(
            num_scalar_prefetch=0,
            grid=(grid,),
            in_specs=[
                pl.BlockSpec((H + 2, W + 2, tb), lambda b: (0, 0, b)),
                pl.BlockSpec((H + 2, W + 2, tb), lambda b: (0, 0, b)),
            ],
            out_specs=pl.BlockSpec((1, W, tb), lambda b: (b, 0, 0)),
        ),
        compiler_params=pltpu.CompilerParams(
            # Each step writes its own output block -> batch axis is parallel
            # (enables v7x megacore; no-op on single-TC v5e/v6e).
            dimension_semantics=("parallel",)),
    )(p, t)

    count = N * C * H * W
    # loss_x + loss_y = (sum_x + sum_y) / count   (both MSE denominators equal)
    return jnp.sum(partials) / jnp.float32(count)


def _reference_loss(pred, true):
    """Pure-JAX reference (lax conv), mirrors the PyTorch forward."""
    sx = jnp.asarray(SOBEL_X, jnp.float32).reshape(1, 1, 3, 3)
    sy = jnp.asarray(SOBEL_Y, jnp.float32).reshape(1, 1, 3, 3)

    def conv(x, k):
        return jax.lax.conv_general_dilated(
            x, k, window_strides=(1, 1), padding=((1, 1), (1, 1)),
            dimension_numbers=("NCHW", "OIHW", "NCHW"))

    psx, psy = conv(pred, sx), conv(pred, sy)
    tsx, tsy = conv(true, sx), conv(true, sy)
    return jnp.mean((psx - tsx) ** 2) + jnp.mean((psy - tsy) ** 2)


if __name__ == "__main__":
    key = jax.random.PRNGKey(0)
    k1, k2 = jax.random.split(key)
    N, C, H, W = 2, 1, 16, 16
    pred = jax.random.normal(k1, (N, C, H, W), dtype=jnp.float32)
    true = jax.random.normal(k2, (N, C, H, W), dtype=jnp.float32)

    loss = jax.jit(sobel_loss)(pred, true)   # jit so transpose+pad fuse into one pass
    jax.block_until_ready(loss)

    ref = _reference_loss(pred, true)
    assert jnp.allclose(loss, ref, rtol=1e-4, atol=1e-5), (loss, ref)

    print("KERNEL_OK")
</pallas_src>

<mosaic_0001>
module attributes {stable_mosaic.version = 11 : i64} {
  func.func @_sobel_loss_kernel(%arg0: i32, %arg1: memref<18x18x128xf32, #tpu.memory_space<vmem>>, %arg2: memref<18x18x128xf32, #tpu.memory_space<vmem>>, %arg3: memref<1x16x128xf32, #tpu.memory_space<vmem>>) attributes {dimension_semantics = [#tpu.dimension_semantics<parallel>], iteration_bounds = array<i64: 1>, scalar_prefetch = 0 : i64, scratch_operands = 0 : i64, tpu.core_type = #tpu.core_type<tc>, window_params = [{transform_indices = @transform_0, window_bounds = array<i64: 18, 18, 128>}, {transform_indices = @transform_1, window_bounds = array<i64: 18, 18, 128>}, {transform_indices = @transform_2, window_bounds = array<i64: 1, 16, 128>}]} {
    %c0 = arith.constant 0 : index
    %c0_0 = arith.constant 0 : index
    %c0_1 = arith.constant 0 : index
    %0 = vector.load %arg1[%c0, %c0_0, %c0_1] : memref<18x18x128xf32, #tpu.memory_space<vmem>>, vector<18x18x128xf32>
    %c0_2 = arith.constant 0 : index
    %c0_3 = arith.constant 0 : index
    %c0_4 = arith.constant 0 : index
    %1 = vector.load %arg2[%c0_2, %c0_3, %c0_4] : memref<18x18x128xf32, #tpu.memory_space<vmem>>, vector<18x18x128xf32>
    %2 = arith.subf %0, %1 : vector<18x18x128xf32>
    %3 = vector.extract_strided_slice %2 {offsets = [0, 0, 0], sizes = [16, 18, 128], strides = [1, 1, 1]} : vector<18x18x128xf32> to vector<16x18x128xf32>
    %4 = vector.extract_strided_slice %2 {offsets = [1, 0, 0], sizes = [16, 18, 128], strides = [1, 1, 1]} : vector<18x18x128xf32> to vector<16x18x128xf32>
    %5 = vector.extract_strided_slice %2 {offsets = [2, 0, 0], sizes = [16, 18, 128], strides = [1, 1, 1]} : vector<18x18x128xf32> to vector<16x18x128xf32>
    %cst = arith.constant 2.000000e+00 : f32
    %6 = vector.broadcast %cst : f32 to vector<16x18x128xf32>
    %7 = arith.mulf %6, %4 : vector<16x18x128xf32>
    %8 = arith.addf %3, %7 : vector<16x18x128xf32>
    %9 = arith.addf %8, %5 : vector<16x18x128xf32>
    %10 = arith.subf %5, %3 : vector<16x18x128xf32>
    %11 = vector.extract_strided_slice %9 {offsets = [0, 2, 0], sizes = [16, 16, 128], strides = [1, 1, 1]} : vector<16x18x128xf32> to vector<16x16x128xf32>
    %12 = vector.extract_strided_slice %9 {offsets = [0, 0, 0], sizes = [16, 16, 128], strides = [1, 1, 1]} : vector<16x18x128xf32> to vector<16x16x128xf32>
    %13 = arith.subf %11, %12 : vector<16x16x128xf32>
    %14 = vector.extract_strided_slice %10 {offsets = [0, 0, 0], sizes = [16, 16, 128], strides = [1, 1, 1]} : vector<16x18x128xf32> to vector<16x16x128xf32>
    %15 = vector.extract_strided_slice %10 {offsets = [0, 1, 0], sizes = [16, 16, 128], strides = [1, 1, 1]} : vector<16x18x128xf32> to vector<16x16x128xf32>
    %cst_5 = arith.constant 2.000000e+00 : f32
    %16 = vector.broadcast %cst_5 : f32 to vector<16x16x128xf32>
    %17 = arith.mulf %16, %15 : vector<16x16x128xf32>
    %18 = arith.addf %14, %17 : vector<16x16x128xf32>
    %19 = vector.extract_strided_slice %10 {offsets = [0, 2, 0], sizes = [16, 16, 128], strides = [1, 1, 1]} : vector<16x18x128xf32> to vector<16x16x128xf32>
    %20 = arith.addf %18, %19 : vector<16x16x128xf32>
    %21 = arith.mulf %13, %13 : vector<16x16x128xf32>
    %22 = arith.mulf %20, %20 : vector<16x16x128xf32>
    %23 = arith.addf %21, %22 : vector<16x16x128xf32>
    %cst_6 = arith.constant dense<0.000000e+00> : vector<16x128xf32>
    %24 = vector.multi_reduction <add>, %23, %cst_6 [0] : vector<16x16x128xf32> to vector<16x128xf32>
    %25 = vector.shape_cast %24 : vector<16x128xf32> to vector<1x16x128xf32>
    %c0_7 = arith.constant 0 : index
    %c0_8 = arith.constant 0 : index
    %c0_9 = arith.constant 0 : index
    %26 = vector.load %arg3[%c0_7, %c0_8, %c0_9] : memref<1x16x128xf32, #tpu.memory_space<vmem>>, vector<1x16x128xf32>
    tpu.vector_store %arg3[%c0_7, %c0_8, %c0_9], %25 {strides = array<i32>} : memref<1x16x128xf32, #tpu.memory_space<vmem>>, vector<1x16x128xf32>,
    return
  }
  func.func @transform_0(%arg0: i32) -> (i32, i32, i32) {
    %c0_i32 = arith.constant 0 : i32
    %c0_i32_0 = arith.constant 0 : i32
    %c0_i32_1 = arith.constant 0 : i32
    return %c0_i32, %c0_i32_0, %arg0 : i32, i32, i32
  }
  func.func @transform_1(%arg0: i32) -> (i32, i32, i32) {
    %c0_i32 = arith.constant 0 : i32
    %c0_i32_0 = arith.constant 0 : i32
    %c0_i32_1 = arith.constant 0 : i32
    return %c0_i32, %c0_i32_0, %arg0 : i32, i32, i32
  }
  func.func @transform_2(%arg0: i32) -> (i32, i32, i32) {
    %c0_i32 = arith.constant 0 : i32
    %c0_i32_0 = arith.constant 0 : i32
    %c0_i32_1 = arith.constant 0 : i32
    return %arg0, %c0_i32, %c0_i32_0 : i32, i32, i32
  }
}

</mosaic_0001>

<bundles_post_ra>
// kernel: sobel_loss.1
= control target key start
LH: loop header
LB: loop body
LE: loop exit
PB: predicated region body
PF: predicated region fallthrough
CT: control target
= control target key end

     0   :  { %vm397_vm0 = vcmask 1041408   ;;  %vm638_vm1 = vcmask 1046528   ;;  %vm831_vm2 = vcmask 1045504   ;;  %vm1232_vm3 = vcmask 1047554   ;;  %s3492_s0 = inlined_call_operand.vmem [shape: f32[18,18,128], index: 0, kind: input, shape index: {}]   ;;  %s3493_s1 = inlined_call_operand.vmem [shape: f32[18,18,128], index: 1, kind: input, shape index: {}]   ;;  %s3494_s2 = inlined_call_operand.vmem [shape: f32[1,16,128], index: 2, kind: output, shape index: {}]  }
   0x1   :  { %v11_v0 = vld [vmem:[%s3492_s0] sm:$0xff]  ;;  %v12_v1 = vld [vmem:[%s3492_s0 + $0x8] sm:$0xff]  ;;  %v13_v2 = vld [vmem:[%s3492_s0 + $0x10] sm:$0x3] }
   0x2   :  { %v14_v3 = vld [vmem:[%s3492_s0 + $0x18] sm:$0xff]  ;;  %v15_v4 = vld [vmem:[%s3492_s0 + $0x20] sm:$0xff]  ;;  %v16_v5 = vld [vmem:[%s3492_s0 + $0x28] sm:$0x3] }
   0x3   :  { %v17_v6 = vld [vmem:[%s3492_s0 + $0x30] sm:$0xff]  ;;  %v18_v7 = vld [vmem:[%s3492_s0 + $0x38] sm:$0xff]  ;;  %v65_v8 = vld [vmem:[%s3493_s1] sm:$0xff] }
   0x4   :  { %v66_v9 = vld [vmem:[%s3493_s1 + $0x8] sm:$0xff]  ;;  %v67_v10 = vld [vmem:[%s3493_s1 + $0x10] sm:$0x3]  ;;  %v19_v11 = vld [vmem:[%s3492_s0 + $0x40] sm:$0x3]  ;;  %v1440_v36 = vsub.f32 %v11_v0, %v65_v8 }
   0x5   :  { %v20_v12 = vld [vmem:[%s3492_s0 + $0x48] sm:$0xff]  ;;  %v21_v13 = vld [vmem:[%s3492_s0 + $0x50] sm:$0xff]  ;;  %v22_v14 = vld [vmem:[%s3492_s0 + $0x58] sm:$0x3]  ;;  %v1442_v37 = vsub.f32 %v12_v1, %v66_v9  ;;  %v1444_v38 = vsub.f32 %v13_v2, %v67_v10 }
   0x6   :  { %v68_v15 = vld [vmem:[%s3493_s1 + $0x18] sm:$0xff]  ;;  %v69_v16 = vld [vmem:[%s3493_s1 + $0x20] sm:$0xff]  ;;  %v70_v17 = vld [vmem:[%s3493_s1 + $0x28] sm:$0x3]  ;;  %3683 = vst [vmem:[#allocation2_spill] sm:$0xff] %v1440_v36 }
   0x7   :  { %v23_v18 = vld [vmem:[%s3492_s0 + $0x60] sm:$0xff]  ;;  %v24_v19 = vld [vmem:[%s3492_s0 + $0x68] sm:$0xff]  ;;  %v25_v20 = vld [vmem:[%s3492_s0 + $0x70] sm:$0x3]  ;;  %3684 = vst [vmem:[#allocation3_spill] sm:$0xff] %v1442_v37  ;;  %v1446_v39 = vsub.f32 %v14_v3, %v68_v15  ;;  %v1466_v46 = vsub.f32 %v15_v4, %v69_v16  ;;  %v1468_v47 = vsub.f32 %v16_v5, %v70_v17 }
   0x8   :  { %v71_v21 = vld [vmem:[%s3493_s1 + $0x30] sm:$0xff]  ;;  %v72_v22 = vld [vmem:[%s3493_s1 + $0x38] sm:$0xff]  ;;  %v73_v23 = vld [vmem:[%s3493_s1 + $0x40] sm:$0x3]  ;;  %3685 = vst [vmem:[#allocation4_spill] sm:$0xff] %v1444_v38 }
   0x9   :  { %v26_v24 = vld [vmem:[%s3492_s0 + $0x78] sm:$0xff]  ;;  %v27_v25 = vld [vmem:[%s3492_s0 + $0x80] sm:$0xff]  ;;  %v28_v26 = vld [vmem:[%s3492_s0 + $0x88] sm:$0x3]  ;;  %3686 = vst [vmem:[#allocation5_spill] sm:$0xff] %v1446_v39  ;;  %v1470_v48 = vsub.f32 %v17_v6, %v71_v21  ;;  %v1472_v49 = vsub.f32 %v18_v7, %v72_v22  ;;  %v1492_v56 = vsub.f32 %v19_v11, %v73_v23  ;;  %v1525_v5 = vmul.f32 2.0, %v1446_v39 }
   0xa   :  { %v74_v27 = vld [vmem:[%s3493_s1 + $0x48] sm:$0xff]  ;;  %v75_v28 = vld [vmem:[%s3493_s1 + $0x50] sm:$0xff]  ;;  %v76_v29 = vld [vmem:[%s3493_s1 + $0x58] sm:$0x3]  ;;  %3687 = vst [vmem:[#allocation6_spill] sm:$0xff] %v1466_v46  ;;  %v1552_v15 = vmul.f32 2.0, %v1466_v46 }
   0xb   :  { %v29_v30 = vld [vmem:[%s3492_s0 + $0x90] sm:$0xff]  ;;  %v30_v31 = vld [vmem:[%s3492_s0 + $0x98] sm:$0xff]  ;;  %v31_v32 = vld [vmem:[%s3492_s0 + $0xa0] sm:$0x3]  ;;  %3688 = vst [vmem:[#allocation7_spill] sm:$0xff] %v1468_v47  ;;  %v1494_v57 = vsub.f32 %v20_v12, %v74_v27  ;;  %v1496_v58 = vsub.f32 %v21_v13, %v75_v28  ;;  %v1498_v59 = vsub.f32 %v22_v14, %v76_v29 }
   0xc   :  { %v77_v33 = vld [vmem:[%s3493_s1 + $0x60] sm:$0xff]  ;;  %v78_v34 = vld [vmem:[%s3493_s1 + $0x68] sm:$0xff]  ;;  %v79_v35 = vld [vmem:[%s3493_s1 + $0x70] sm:$0x3]  ;;  %3689 = vst [vmem:[#allocation8_spill] sm:$0xff] %v1470_v48 }
   0xd   :  { %v32_v40 = vld [vmem:[%s3492_s0 + $0xa8] sm:$0xff]  ;;  %v33_v41 = vld [vmem:[%s3492_s0 + $0xb0] sm:$0xff]  ;;  %v34_v42 = vld [vmem:[%s3492_s0 + $0xb8] sm:$0x3]  ;;  %3690 = vst [vmem:[#allocation9_spill] sm:$0xff] %v1472_v49  ;;  %v1518_v2 = vsub.f32 %v23_v18, %v77_v33  ;;  %v1520_v3 = vsub.f32 %v24_v19, %v78_v34  ;;  %v1522_v4 = vsub.f32 %v25_v20, %v79_v35  ;;  %v1606_v35 = vmul.f32 2.0, %v1470_v48 }
   0xe   :  { %v80_v43 = vld [vmem:[%s3493_s1 + $0x78] sm:$0xff]  ;;  %v81_v44 = vld [vmem:[%s3493_s1 + $0x80] sm:$0xff]  ;;  %v82_v45 = vld [vmem:[%s3493_s1 + $0x88] sm:$0x3]  ;;  %3691 = vst [vmem:[#allocation10_spill] sm:$0xff] %v1492_v56  ;;  %v1660_v48 = vmul.f32 2.0, %v1492_v56 }
   0xf   :  { %v35_v50 = vld [vmem:[%s3492_s0 + $0xc0] sm:$0xff]  ;;  %v36_v51 = vld [vmem:[%s3492_s0 + $0xc8] sm:$0xff]  ;;  %v37_v52 = vld [vmem:[%s3492_s0 + $0xd0] sm:$0x3]  ;;  %3692 = vst [vmem:[#allocation11_spill] sm:$0xff] %v1494_v57  ;;  %v1545_v12 = vsub.f32 %v26_v24, %v80_v43  ;;  %v1547_v13 = vsub.f32 %v27_v25, %v81_v44  ;;  %v1549_v14 = vsub.f32 %v28_v26, %v82_v45  ;;  %v1579_v25 = vmul.f32 2.0, %v1468_v47 }
  0x10   :  { %v83_v53 = vld [vmem:[%s3493_s1 + $0x90] sm:$0xff]  ;;  %v84_v54 = vld [vmem:[%s3493_s1 + $0x98] sm:$0xff]  ;;  %v85_v55 = vld [vmem:[%s3493_s1 + $0xa0] sm:$0x3]  ;;  %3693 = vst [vmem:[#allocation12_spill] sm:$0xff] %v1496_v58 }
  0x11   :  { %3694 = vst [vmem:[#allocation13_spill] sm:$0xff] %v1498_v59  ;;  %v38_v60 = vld [vmem:[%s3492_s0 + $0xd8] sm:$0xff]  ;;  %v39_v61 = vld [vmem:[%s3492_s0 + $0xe0] sm:$0xff]  ;;  %v40_v62 = vld [vmem:[%s3492_s0 + $0xe8] sm:$0x3]  ;;  %v1572_v22 = vsub.f32 %v29_v30, %v83_v53  ;;  %v1574_v23 = vsub.f32 %v30_v31, %v84_v54  ;;  %v1576_v24 = vsub.f32 %v31_v32, %v85_v55 }
  0x12   :  { %v86_v63 = vld [vmem:[%s3493_s1 + $0xa8] sm:$0xff]  ;;  %v87_v0 = vld [vmem:[%s3493_s1 + $0xb0] sm:$0xff]  ;;  %v88_v1 = vld [vmem:[%s3493_s1 + $0xb8] sm:$0x3]  ;;  %3695 = vst [vmem:[#allocation14_spill] sm:$0xff] %v1518_v2 }
  0x13   :  { %3696 = vst [vmem:[#allocation15_spill] sm:$0xff] %v1520_v3  ;;  %3697 = vst [vmem:[#allocation16_spill] sm:$0xff] %v1522_v4  ;;  %v41_v6 = vld [vmem:[%s3492_s0 + $0xf0] sm:$0xff]  ;;  %v42_v7 = vld [vmem:[%s3492_s0 + $0xf8] sm:$0xff]  ;;  %v1599_v32 = vsub.f32 %v32_v40, %v86_v63  ;;  %v1601_v33 = vsub.f32 %v33_v41, %v87_v0  ;;  %v1603_v34 = vsub.f32 %v34_v42, %v88_v1  ;;  %v1633_v63 = vmul.f32 2.0, %v1472_v49 }
  0x14   :  { %3698 = vst [vmem:[#allocation17_spill] sm:$0xff] %v1525_v5  ;;  %v43_v8 = vld [vmem:[%s3492_s0 + $0x100] sm:$0x3]  ;;  %v90_v10 = vld [vmem:[%s3493_s1 + $0xc8] sm:$0xff]  ;;  %v91_v11 = vld [vmem:[%s3493_s1 + $0xd0] sm:$0x3] }
  0x15   :  { %v89_v9 = vld [vmem:[%s3493_s1 + $0xc0] sm:$0xff]  ;;  %3699 = vst [vmem:[#allocation18_spill] sm:$0xff] %v1545_v12  ;;  %3700 = vst [vmem:[#allocation19_spill] sm:$0xff] %v1547_v13  ;;  %v44_v16 = vld [vmem:[%s3492_s0 + $0x108] sm:$0xff]  ;;  %v1628_v54 = vsub.f32 %v36_v51, %v90_v10  ;;  %v1630_v55 = vsub.f32 %v37_v52, %v91_v11 }
  0x16   :  { %3701 = vst [vmem:[#allocation20_spill] sm:$0xff] %v1549_v14  ;;  %3702 = vst [vmem:[#allocation21_spill] sm:$0xff] %v1552_v15  ;;  %v45_v17 = vld [vmem:[%s3492_s0 + $0x110] sm:$0xff]  ;;  %v46_v18 = vld [vmem:[%s3492_s0 + $0x118] sm:$0x3]  ;;  %v1626_v53 = vsub.f32 %v35_v50, %v89_v9 }
  0x17   :  { %v92_v19 = vld [vmem:[%s3493_s1 + $0xd8] sm:$0xff]  ;;  %v93_v20 = vld [vmem:[%s3493_s1 + $0xe0] sm:$0xff]  ;;  %v94_v21 = vld [vmem:[%s3493_s1 + $0xe8] sm:$0x3]  ;;  %3703 = vst [vmem:[#allocation22_spill] sm:$0xff] %v1572_v22 }
  0x18   :  { %3704 = vst [vmem:[#allocation23_spill] sm:$0xff] %v1574_v23  ;;  %3705 = vst [vmem:[#allocation24_spill] sm:$0xff] %v1576_v24  ;;  %v47_v26 = vld [vmem:[%s3492_s0 + $0x120] sm:$0xff]  ;;  %v48_v27 = vld [vmem:[%s3492_s0 + $0x128] sm:$0xff]  ;;  %v1653_v10 = vsub.f32 %v38_v60, %v92_v19  ;;  %v1655_v11 = vsub.f32 %v39_v61, %v93_v20  ;;  %v1657_v49 = vsub.f32 %v40_v62, %v94_v21 }
  0x19   :  { %3706 = vst [vmem:[#allocation25_spill] sm:$0xff] %v1579_v25  ;;  %v49_v28 = vld [vmem:[%s3492_s0 + $0x130] sm:$0x3]  ;;  %v96_v30 = vld [vmem:[%s3493_s1 + $0xf8] sm:$0xff]  ;;  %v97_v31 = vld [vmem:[%s3493_s1 + $0x100] sm:$0x3] }
  0x1a   :  { %v95_v29 = vld [vmem:[%s3493_s1 + $0xf0] sm:$0xff]  ;;  %3707 = vst [vmem:[#allocation26_spill] sm:$0xff] %v1599_v32  ;;  %3708 = vst [vmem:[#allocation27_spill] sm:$0xff] %v1601_v33  ;;  %v50_v43 = vld [vmem:[%s3492_s0 + $0x138] sm:$0xff]  ;;  %v1682_v21 = vsub.f32 %v42_v7, %v96_v30  ;;  %v1684_v56 = vsub.f32 %v43_v8, %v97_v31 }
  0x1b   :  { %3709 = vst [vmem:[#allocation28_spill] sm:$0xff] %v1603_v34  ;;  %3710 = vst [vmem:[#allocation29_spill] sm:$0xff] %v1606_v35  ;;  %v51_v44 = vld [vmem:[%s3492_s0 + $0x140] sm:$0xff]  ;;  %v52_v40 = vld [vmem:[%s3492_s0 + $0x148] sm:$0x3]  ;;  %v1680_v20 = vsub.f32 %v41_v6, %v95_v29 }
  0x1c   :  { %v98_v41 = vld [vmem:[%s3493_s1 + $0x108] sm:$0xff]  ;;  %v99_v42 = vld [vmem:[%s3493_s1 + $0x110] sm:$0xff]  ;;  %v100_v45 = vld [vmem:[%s3493_s1 + $0x118] sm:$0x3]  ;;  %3711 = vst [vmem:[#allocation30_spill] sm:$0xff] %v1626_v53 }
  0x1d   :  { %3712 = vst [vmem:[#allocation31_spill] sm:$0xff] %v1628_v54  ;;  %3713 = vst [vmem:[#allocation32_spill] sm:$0xff] %v1630_v55  ;;  %v53_v0 = vld [vmem:[%s3492_s0 + $0x150] sm:$0xff]  ;;  %v54_v1 = vld [vmem:[%s3492_s0 + $0x158] sm:$0xff]  ;;  %v1707_v30 = vsub.f32 %v44_v16, %v98_v41  ;;  %v1709_v31 = vsub.f32 %v45_v17, %v99_v42 }
  0x1e   :  { %3714 = vst [vmem:[#allocation33_spill] sm:$0xff] %v1633_v63  ;;  %v55_v50 = vld [vmem:[%s3492_s0 + $0x160] sm:$0x3]  ;;  %v102_v52 = vld [vmem:[%s3493_s1 + $0x128] sm:$0xff]  ;;  %v103_v9 = vld [vmem:[%s3493_s1 + $0x130] sm:$0x3] }
  0x1f   :  { %v101_v51 = vld [vmem:[%s3493_s1 + $0x120] sm:$0xff]  ;;  %3715 = vst [vmem:[#allocation34_spill] sm:$0xff] %v1653_v10  ;;  %3716 = vst [vmem:[#allocation35_spill] sm:$0xff] %v1655_v11  ;;  %v56_v47 = vld [vmem:[%s3492_s0 + $0x168] sm:$0xff] }
  0x20   :  { %3717 = vst [vmem:[#allocation36_spill] sm:$0xff] %v1657_v49  ;;  %3718 = vst [vmem:[#allocation37_spill] sm:$0xff] %v1660_v48  ;;  %v57_v63 = vld [vmem:[%s3492_s0 + $0x170] sm:$0xff]  ;;  %v58_v60 = vld [vmem:[%s3492_s0 + $0x178] sm:$0x3]  ;;  %v1687_v48 = vmul.f32 2.0, %v1494_v57  ;;  %v1711_v57 = vsub.f32 %v46_v18, %v100_v45  ;;  %v1734_v42 = vsub.f32 %v47_v26, %v101_v51  ;;  %v1736_v45 = vsub.f32 %v48_v27, %v102_v52 }
  0x21   :  { %v104_v61 = vld [vmem:[%s3493_s1 + $0x138] sm:$0xff]  ;;  %v105_v62 = vld [vmem:[%s3493_s1 + $0x140] sm:$0xff]  ;;  %v106_v19 = vld [vmem:[%s3493_s1 + $0x148] sm:$0x3]  ;;  %3719 = vst [vmem:[#allocation38_spill] sm:$0xff] %v1680_v20  ;;  %v1759_v52 = vmul.f32 2.0, %v1518_v2 }
  0x22   :  { %3720 = vst [vmem:[#allocation39_spill] sm:$0xff] %v1682_v21  ;;  %3721 = vst [vmem:[#allocation40_spill] sm:$0xff] %v1684_v56  ;;  %v59_v46 = vld [vmem:[%s3492_s0 + $0x180] sm:$0xff]  ;;  %v60_v35 = vld [vmem:[%s3492_s0 + $0x188] sm:$0xff]  ;;  %v1752_v51 = vsub.f32 %v50_v43, %v104_v61  ;;  %v1754_v27 = vsub.f32 %v51_v44, %v105_v62  ;;  %v183_v62 = vmul.f32 2.0, %v1520_v3 }
  0x23   :  { %3722 = vst [vmem:[#allocation41_spill] sm:$0xff] %v1687_v48  ;;  %v61_v6 = vld [vmem:[%s3492_s0 + $0x190] sm:$0x3]  ;;  %v108_v8 = vld [vmem:[%s3493_s1 + $0x158] sm:$0xff]  ;;  %v109_v29 = vld [vmem:[%s3493_s1 + $0x160] sm:$0x3] }
  0x24   :  { %v107_v7 = vld [vmem:[%s3493_s1 + $0x150] sm:$0xff]  ;;  %3723 = vst [vmem:[#allocation42_spill] sm:$0xff] %v1707_v30  ;;  %3724 = vst [vmem:[#allocation43_spill] sm:$0xff] %v1709_v31  ;;  %v1714_v48 = vmul.f32 2.0, %v1496_v58  ;;  %v62_v39 = vld [vmem:[%s3492_s0 + $0x198] sm:$0xff]  ;;  %v1738_v58 = vsub.f32 %v49_v28, %v103_v9  ;;  %v1756_v28 = vsub.f32 %v52_v40, %v106_v19  ;;  %v1772_v44 = vsub.f32 %v54_v1, %v108_v8 }
  0x25   :  { %3725 = vst [vmem:[#allocation44_spill] sm:$0xff] %v1711_v57  ;;  %v63_v25 = vld [vmem:[%s3492_s0 + $0x1a0] sm:$0xff]  ;;  %v64_v16 = vld [vmem:[%s3492_s0 + $0x1a8] sm:$0x3]  ;;  %v111_v18 = vld [vmem:[%s3493_s1 + $0x170] sm:$0xff]  ;;  %v1770_v61 = vsub.f32 %v53_v0, %v107_v7  ;;  %v1774_v40 = vsub.f32 %v55_v50, %v109_v29  ;;  %v185_v1 = vmul.f32 2.0, %v1545_v12 }
  0x26   :  { %3726 = vst [vmem:[#allocation45_spill] sm:$0xff] %v1714_v48  ;;  %v110_v17 = vld [vmem:[%s3493_s1 + $0x168] sm:$0xff]  ;;  %v112_v41 = vld [vmem:[%s3493_s1 + $0x178] sm:$0x3]  ;;  %3727 = vst [vmem:[#allocation46_spill] sm:$0xff] %v1734_v42  ;;  %v1741_v48 = vmul.f32 2.0, %v1498_v59  ;;  %v1779_v2 = vsub.f32 %v57_v63, %v111_v18 }
  0x27   :  { %3728 = vst [vmem:[#allocation47_spill] sm:$0xff] %v1736_v45  ;;  %3729 = vst [vmem:[#allocation48_spill] sm:$0xff] %v1738_v58  ;;  %v113_v38 = vld [vmem:[%s3493_s1 + $0x180] sm:$0xff]  ;;  %v114_v15 = vld [vmem:[%s3493_s1 + $0x188] sm:$0xff]  ;;  %v1777_v19 = vsub.f32 %v56_v47, %v110_v17  ;;  %v186_v63 = vmul.f32 2.0, %v1547_v13  ;;  %v188_v8 = vmul.f32 2.0, %v1572_v22 }
  0x28   :  { %3730 = vst [vmem:[#allocation49_spill] sm:$0xff] %v1741_v48  ;;  %v115_v26 = vld [vmem:[%s3493_s1 + $0x190] sm:$0x3]  ;;  %3731 = vst [vmem:[#allocation50_spill] sm:$0xff] %v1752_v51  ;;  %v116_v9 = vld [vmem:[%s3493_s1 + $0x198] sm:$0xff]  ;;  %v184_v48 = vmul.f32 2.0, %v1522_v4  ;;  %v1784_v37 = vsub.f32 %v59_v46, %v113_v38  ;;  %v1786_v5 = vsub.f32 %v60_v35, %v114_v15 }
  0x29   :  { %3732 = vst [vmem:[#allocation51_spill] sm:$0xff] %v1754_v27  ;;  %3733 = vst [vmem:[#allocation52_spill] sm:$0xff] %v1756_v28  ;;  %v117_v59 = vld [vmem:[%s3493_s1 + $0x1a0] sm:$0xff]  ;;  %v118_v43 = vld [vmem:[%s3493_s1 + $0x1a8] sm:$0x3]  ;;  %v1788_v0 = vsub.f32 %v61_v6, %v115_v26  ;;  %v1791_v50 = vsub.f32 %v62_v39, %v116_v9  ;;  %v189_v38 = vmul.f32 2.0, %v1574_v23 }
  0x2a   :  { %3734 = vst [vmem:[#allocation53_spill] sm:$0xff] %v1759_v52  ;;  %3735 = vst [vmem:[#allocation54_spill] sm:$0xff] %v1770_v61  ;;  %v1781_v52 = vsub.f32 %v58_v60, %v112_v41  ;;  %v1793_v7 = vsub.f32 %v63_v25, %v117_v59  ;;  %v1795_v47 = vsub.f32 %v64_v16, %v118_v43  ;;  %v187_v60 = vmul.f32 2.0, %v1549_v14  ;;  %v3758_v23 = vld [vmem:[#allocation8_spill] sm:$0xff]  ;;  %v3760_v14 = vld [vmem:[#allocation9_spill] sm:$0xff] }
  0x2b   :  { %3736 = vst [vmem:[#allocation55_spill] sm:$0xff] %v1772_v44  ;;  %3737 = vst [vmem:[#allocation56_spill] sm:$0xff] %v1774_v40  ;;  %v190_v46 = vmul.f32 2.0, %v1576_v24  ;;  %v191_v15 = vmul.f32 2.0, %v1599_v32  ;;  %v192_v35 = vmul.f32 2.0, %v1601_v33  ;;  %v193_v39 = vmul.f32 2.0, %v1603_v34 }
  0x2c   :  { %3738 = vst [vmem:[#allocation57_spill] sm:$0xff] %v1777_v19  ;;  %3739 = vst [vmem:[#allocation58_spill] sm:$0xff] %v1779_v2  ;;  %v194_v59 = vmul.f32 2.0, %v1626_v53  ;;  %v195_v25 = vmul.f32 2.0, %v1628_v54  ;;  %v196_v6 = vmul.f32 2.0, %v1630_v55  ;;  %v197_v29 = vmul.f32 2.0, %v1653_v10 }
  0x2d   :  { %3740 = vst [vmem:[#allocation59_spill] sm:$0xff] %v1781_v52  ;;  %3741 = vst [vmem:[#allocation60_spill] sm:$0xff] %v1784_v37  ;;  %v198_v16 = vmul.f32 2.0, %v1655_v11  ;;  %v199_v17 = vmul.f32 2.0, %v1657_v49  ;;  %v200_v18 = vmul.f32 2.0, %v1680_v20  ;;  %v201_v41 = vmul.f32 2.0, %v1682_v21 }
  0x2e   :  { %3742 = vst [vmem:[#allocation61_spill] sm:$0xff] %v1786_v5  ;;  %3743 = vst [vmem:[#allocation62_spill] sm:$0xff] %v1788_v0  ;;  %v202_v26 = vmul.f32 2.0, %v1684_v56  ;;  %v203_v9 = vmul.f32 2.0, %v1707_v30  ;;  %v204_v43 = vmul.f32 2.0, %v1709_v31  ;;  %v208_v11 = vmul.f32 2.0, %v1738_v58 }
  0x2f   :  { %3744 = vst [vmem:[#allocation63_spill] sm:$0xff] %v1791_v50  ;;  %3745 = vst [vmem:[#allocation64_spill] sm:$0xff] %v1793_v7  ;;  %v206_v7 = vmul.f32 2.0, %v1734_v42  ;;  %v207_v50 = vmul.f32 2.0, %v1736_v45  ;;  %v209_v49 = vmul.f32 2.0, %v1752_v51  ;;  %v210_v20 = vmul.f32 2.0, %v1754_v27 }
  0x30   :  { %3746 = vst [vmem:[#allocation65_spill] sm:$0xff] %v1795_v47  ;;  %v205_v47 = vmul.f32 2.0, %v1711_v57  ;;  %v211_v21 = vmul.f32 2.0, %v1756_v28  ;;  %v212_v56 = vmul.f32 2.0, %v1770_v61  ;;  %v213_v30 = vmul.f32 2.0, %v1772_v44  ;;  %v3747_v28 = vld [vmem:[#allocation17_spill] sm:$0xff] }
  0x31   :  { %v214_v31 = vmul.f32 2.0, %v1774_v40  ;;  %v215_v57 = vmul.f32 2.0, %v1777_v19  ;;  %v216_v42 = vmul.f32 2.0, %v1779_v2  ;;  %v217_v45 = vmul.f32 2.0, %v1781_v52  ;;  %v3748_v61 = vld [vmem:[#allocation3_spill] sm:$0xff]  ;;  %v3749_v55 = vld [vmem:[#allocation21_spill] sm:$0xff] }
  0x32   :  { %v218_v58 = vmul.f32 2.0, %v1784_v37  ;;  %v219_v51 = vmul.f32 2.0, %v1786_v5  ;;  %v220_v27 = vmul.f32 2.0, %v1788_v0  ;;  %v221_v10 = vadd.f32 %v3747_v28, %v1440_v36  ;;  %v3750_v54 = vld [vmem:[#allocation4_spill] sm:$0xff]  ;;  %v3751_v40 = vld [vmem:[#allocation25_spill] sm:$0xff]  ;;  %v3754_v33 = vld [vmem:[#allocation6_spill] sm:$0xff] }
  0x33   :  { %v222_v44 = vadd.f32 %v3749_v55, %v3748_v61  ;;  %v223_v53 = vadd.f32 %v3751_v40, %v3750_v54  ;;  %v3752_v19 = vld [vmem:[#allocation5_spill] sm:$0xff]  ;;  %v3756_v37 = vld [vmem:[#allocation7_spill] sm:$0xff]  ;;  %v3762_v13 = vld [vmem:[#allocation10_spill] sm:$0xff] }
  0x34   :  { %v3753_v34 = vld [vmem:[#allocation29_spill] sm:$0xff]  ;;  %v3764_v12 = vld [vmem:[#allocation11_spill] sm:$0xff]  ;;  %v3766_v4 = vld [vmem:[#allocation12_spill] sm:$0xff] }
  0x35   :  { %v224_v2 = vadd.f32 %v3753_v34, %v3752_v19  ;;  %v3755_v52 = vld [vmem:[#allocation33_spill] sm:$0xff]  ;;  %v231_v34 = vadd.f32 %v183_v62, %v3766_v4  ;;  %v3774_v4 = vld [vmem:[#allocation22_spill] sm:$0xff] }
  0x36   :  { %v225_v32 = vadd.f32 %v3755_v52, %v3754_v33  ;;  %v3757_v24 = vld [vmem:[#allocation37_spill] sm:$0xff]  ;;  %v3768_v52 = vld [vmem:[#allocation14_spill] sm:$0xff]  ;;  %v239_v62 = vadd.f32 %v191_v15, %v3774_v4  ;;  %v3782_v4 = vld [vmem:[#allocation32_spill] sm:$0xff] }
  0x37   :  { %v226_v5 = vadd.f32 %v3757_v24, %v3756_v37  ;;  %v3759_v0 = vld [vmem:[#allocation41_spill] sm:$0xff]  ;;  %v233_v33 = vadd.f32 %v185_v1, %v3768_v52  ;;  %v3769_v24 = vld [vmem:[#allocation15_spill] sm:$0xff]  ;;  %v3776_v1 = vld [vmem:[#allocation24_spill] sm:$0xff]  ;;  %v247_v15 = vadd.f32 %v199_v17, %v3782_v4 }
  0x38   :  { %v227_v22 = vadd.f32 %v3759_v0, %v3758_v23  ;;  %v3761_v28 = vld [vmem:[#allocation45_spill] sm:$0xff]  ;;  %v234_v37 = vadd.f32 %v186_v63, %v3769_v24  ;;  %v3770_v0 = vld [vmem:[#allocation16_spill] sm:$0xff]  ;;  %v241_v52 = vadd.f32 %v193_v39, %v3776_v1  ;;  %v3777_v24 = vld [vmem:[#allocation26_spill] sm:$0xff] }
  0x39   :  { %v228_v36 = vadd.f32 %v3761_v28, %v3760_v14  ;;  %v3763_v55 = vld [vmem:[#allocation49_spill] sm:$0xff]  ;;  %v235_v23 = vadd.f32 %v187_v60, %v3770_v0  ;;  %v3771_v14 = vld [vmem:[#allocation18_spill] sm:$0xff]  ;;  %v242_v63 = vadd.f32 %v194_v59, %v3777_v24  ;;  %v3778_v0 = vld [vmem:[#allocation27_spill] sm:$0xff] }
  0x3a   :  { %v229_v61 = vadd.f32 %v3763_v55, %v3762_v13  ;;  %v3765_v40 = vld [vmem:[#allocation53_spill] sm:$0xff]  ;;  %v236_v28 = vadd.f32 %v188_v8, %v3771_v14  ;;  %v3772_v13 = vld [vmem:[#allocation19_spill] sm:$0xff]  ;;  %v243_v60 = vadd.f32 %v195_v25, %v3778_v0  ;;  %v3779_v8 = vld [vmem:[#allocation28_spill] sm:$0xff] }
  0x3b   :  { %v230_v54 = vadd.f32 %v3765_v40, %v3764_v12  ;;  %v3767_v19 = vld [vmem:[#allocation13_spill] sm:$0xff]  ;;  %v237_v55 = vadd.f32 %v189_v38, %v3772_v13  ;;  %v3773_v12 = vld [vmem:[#allocation20_spill] sm:$0xff]  ;;  %v244_v14 = vadd.f32 %v196_v6, %v3779_v8  ;;  %v3780_v13 = vld [vmem:[#allocation30_spill] sm:$0xff] }
  0x3c   :  { %v232_v3 = vadd.f32 %v184_v48, %v3767_v19  ;;  %v238_v40 = vadd.f32 %v190_v46, %v3773_v12  ;;  %v3775_v19 = vld [vmem:[#allocation23_spill] sm:$0xff]  ;;  %v245_v38 = vadd.f32 %v197_v29, %v3780_v13  ;;  %v3785_v24 = vld [vmem:[#allocation36_spill] sm:$0xff]  ;;  %v3786_v0 = vld [vmem:[#allocation38_spill] sm:$0xff] }
  0x3d   :  { %v240_v48 = vadd.f32 %v192_v35, %v3775_v19  ;;  %v3781_v12 = vld [vmem:[#allocation31_spill] sm:$0xff]  ;;  %v3783_v19 = vld [vmem:[#allocation34_spill] sm:$0xff]  ;;  %v250_v59 = vadd.f32 %v202_v26, %v3785_v24  ;;  %v251_v25 = vadd.f32 %v203_v9, %v3786_v0  ;;  %v3788_v13 = vld [vmem:[#allocation40_spill] sm:$0xff] }
  0x3e   :  { %v246_v46 = vadd.f32 %v198_v16, %v3781_v12  ;;  %v248_v35 = vadd.f32 %v200_v18, %v3783_v19  ;;  %v3784_v1 = vld [vmem:[#allocation35_spill] sm:$0xff]  ;;  %v253_v29 = vadd.f32 %v205_v47, %v3788_v13  ;;  %v3789_v12 = vld [vmem:[#allocation42_spill] sm:$0xff]  ;;  %v3791_v18 = vld [vmem:[#allocation44_spill] sm:$0xff] }
  0x3f   :  { %v249_v39 = vadd.f32 %v201_v41, %v3784_v1  ;;  %v3787_v6 = vld [vmem:[#allocation39_spill] sm:$0xff]  ;;  %v254_v16 = vadd.f32 %v206_v7, %v3789_v12  ;;  %v256_v19 = vadd.f32 %v208_v11, %v3791_v18  ;;  %v3792_v1 = vld [vmem:[#allocation46_spill] sm:$0xff]  ;;  %v3794_v0 = vld [vmem:[#allocation48_spill] sm:$0xff] }
  0x40   :  { %v252_v8 = vadd.f32 %v204_v43, %v3787_v6  ;;  %v3790_v4 = vld [vmem:[#allocation43_spill] sm:$0xff]  ;;  %v257_v41 = vadd.f32 %v209_v49, %v3792_v1  ;;  %v259_v9 = vadd.f32 %v211_v21, %v3794_v0  ;;  %v3795_v6 = vld [vmem:[#allocation50_spill] sm:$0xff]  ;;  %v3797_v7 = vld [vmem:[#allocation52_spill] sm:$0xff] }
  0x41   :  { %v255_v17 = vadd.f32 %v207_v50, %v3790_v4  ;;  %v3793_v24 = vld [vmem:[#allocation47_spill] sm:$0xff]  ;;  %v260_v43 = vadd.f32 %v212_v56, %v3795_v6  ;;  %v262_v12 = vadd.f32 %v214_v31, %v3797_v7  ;;  %v3798_v4 = vld [vmem:[#allocation54_spill] sm:$0xff]  ;;  %v3800_v1 = vld [vmem:[#allocation56_spill] sm:$0xff] }
  0x42   :  { %v258_v26 = vadd.f32 %v210_v20, %v3793_v24  ;;  %v3796_v13 = vld [vmem:[#allocation51_spill] sm:$0xff]  ;;  %v263_v50 = vadd.f32 %v215_v57, %v3798_v4  ;;  %v265_v49 = vadd.f32 %v217_v45, %v3800_v1  ;;  %v3801_v20 = vld [vmem:[#allocation57_spill] sm:$0xff]  ;;  %v3802_v0 = vld [vmem:[#allocation58_spill] sm:$0xff] }
  0x43   :  { %v261_v47 = vadd.f32 %v213_v30, %v3796_v13  ;;  %v3799_v11 = vld [vmem:[#allocation55_spill] sm:$0xff]  ;;  %v266_v24 = vadd.f32 %v218_v58, %v3801_v20  ;;  %v267_v21 = vadd.f32 %v219_v51, %v3802_v0  ;;  %v3804_v13 = vld [vmem:[#allocation8_spill] sm:$0xff]  ;;  %v3806_v7 = vld [vmem:[#allocation9_spill] sm:$0xff] }
  0x44   :  { %v264_v18 = vadd.f32 %v216_v42, %v3799_v11  ;;  %v3803_v6 = vld [vmem:[#allocation59_spill] sm:$0xff]  ;;  %v1891_v30 = vadd.f32 %v221_v10, %v3804_v13  ;;  %v1894_v31 = vadd.f32 %v222_v44, %v3806_v7  ;;  %v3808_v4 = vld [vmem:[#allocation10_spill] sm:$0xff]  ;;  %v3812_v1 = vld [vmem:[#allocation12_spill] sm:$0xff] }
  0x45   :  { %v268_v56 = vadd.f32 %v220_v27, %v3803_v6  ;;  %v1897_v57 = vadd.f32 %v223_v53, %v3808_v4  ;;  %v3810_v11 = vld [vmem:[#allocation11_spill] sm:$0xff]  ;;  %v1903_v45 = vadd.f32 %v225_v32, %v3812_v1  ;;  %v3814_v58 = vld [vmem:[#allocation13_spill] sm:$0xff]  ;;  %v3816_v51 = vld [vmem:[#allocation14_spill] sm:$0xff] }
  0x46   :  { %3805 = vst [vmem:[#allocation17_spill] sm:$0xff] %v1891_v30  ;;  %3807 = vst [vmem:[#allocation21_spill] sm:$0xff] %v1894_v31  ;;  %v1900_v42 = vadd.f32 %v224_v2, %v3810_v11  ;;  %v1906_v20 = vadd.f32 %v226_v5, %v3814_v58  ;;  %v1909_v27 = vadd.f32 %v227_v22, %v3816_v51  ;;  %v3818_v10 = vld [vmem:[#allocation15_spill] sm:$0xff]  ;;  %v3820_v44 = vld [vmem:[#allocation16_spill] sm:$0xff] }
  0x47   :  { %3809 = vst [vmem:[#allocation25_spill] sm:$0xff] %v1897_v57  ;;  %3813 = vst [vmem:[#allocation33_spill] sm:$0xff] %v1903_v45  ;;  %v1912_v30 = vadd.f32 %v228_v36, %v3818_v10  ;;  %v1915_v31 = vadd.f32 %v229_v61, %v3820_v44  ;;  %v3822_v53 = vld [vmem:[#allocation18_spill] sm:$0xff]  ;;  %v3824_v2 = vld [vmem:[#allocation19_spill] sm:$0xff] }
  0x48   :  { %3811 = vst [vmem:[#allocation29_spill] sm:$0xff] %v1900_v42  ;;  %3815 = vst [vmem:[#allocation37_spill] sm:$0xff] %v1906_v20  ;;  %v1918_v57 = vadd.f32 %v230_v54, %v3822_v53  ;;  %v1921_v42 = vadd.f32 %v231_v34, %v3824_v2  ;;  %v3826_v32 = vld [vmem:[#allocation20_spill] sm:$0xff]  ;;  %v3828_v5 = vld [vmem:[#allocation22_spill] sm:$0xff] }
  0x49   :  { %3817 = vst [vmem:[#allocation41_spill] sm:$0xff] %v1909_v27  ;;  %3819 = vst [vmem:[#allocation45_spill] sm:$0xff] %v1912_v30  ;;  %v1924_v45 = vadd.f32 %v232_v3, %v3826_v32  ;;  %v1927_v20 = vadd.f32 %v233_v33, %v3828_v5  ;;  %v3830_v22 = vld [vmem:[#allocation23_spill] sm:$0xff]  ;;  %v3832_v36 = vld [vmem:[#allocation24_spill] sm:$0xff] }
  0x4a   :  { %3821 = vst [vmem:[#allocation49_spill] sm:$0xff] %v1915_v31  ;;  %3823 = vst [vmem:[#allocation53_spill] sm:$0xff] %v1918_v57  ;;  %v1930_v27 = vadd.f32 %v234_v37, %v3830_v22  ;;  %v1933_v30 = vadd.f32 %v235_v23, %v3832_v36  ;;  %v3834_v61 = vld [vmem:[#allocation26_spill] sm:$0xff]  ;;  %v3836_v54 = vld [vmem:[#allocation27_spill] sm:$0xff] }
  0x4b   :  { %3825 = vst [vmem:[#allocation58_spill] sm:$0xff] %v1921_v42  ;;  %3827 = vst [vmem:[#allocation59_spill] sm:$0xff] %v1924_v45  ;;  %v1936_v31 = vadd.f32 %v236_v28, %v3834_v61  ;;  %v1939_v57 = vadd.f32 %v237_v55, %v3836_v54  ;;  %v3838_v34 = vld [vmem:[#allocation28_spill] sm:$0xff]  ;;  %v3840_v3 = vld [vmem:[#allocation30_spill] sm:$0xff] }
  0x4c   :  { %3829 = vst [vmem:[#allocation8_spill] sm:$0xff] %v1927_v20  ;;  %3831 = vst [vmem:[#allocation9_spill] sm:$0xff] %v1930_v27  ;;  %v1942_v42 = vadd.f32 %v238_v40, %v3838_v34  ;;  %v1945_v45 = vadd.f32 %v239_v62, %v3840_v3  ;;  %v3842_v33 = vld [vmem:[#allocation31_spill] sm:$0xff]  ;;  %v3844_v37 = vld [vmem:[#allocation32_spill] sm:$0xff] }
  0x4d   :  { %3833 = vst [vmem:[#allocation10_spill] sm:$0xff] %v1933_v30  ;;  %3835 = vst [vmem:[#allocation11_spill] sm:$0xff] %v1936_v31  ;;  %v1948_v20 = vadd.f32 %v240_v48, %v3842_v33  ;;  %v1951_v27 = vadd.f32 %v241_v52, %v3844_v37  ;;  %v3846_v23 = vld [vmem:[#allocation34_spill] sm:$0xff]  ;;  %v3848_v28 = vld [vmem:[#allocation35_spill] sm:$0xff] }
  0x4e   :  { %3837 = vst [vmem:[#allocation12_spill] sm:$0xff] %v1939_v57  ;;  %3839 = vst [vmem:[#allocation13_spill] sm:$0xff] %v1942_v42  ;;  %v1954_v30 = vadd.f32 %v242_v63, %v3846_v23  ;;  %v1957_v31 = vadd.f32 %v243_v60, %v3848_v28  ;;  %v3850_v55 = vld [vmem:[#allocation36_spill] sm:$0xff]  ;;  %v3852_v40 = vld [vmem:[#allocation38_spill] sm:$0xff] }
  0x4f   :  { %3841 = vst [vmem:[#allocation14_spill] sm:$0xff] %v1945_v45  ;;  %3843 = vst [vmem:[#allocation15_spill] sm:$0xff] %v1948_v20  ;;  %v1960_v57 = vadd.f32 %v244_v14, %v3850_v55  ;;  %v1963_v42 = vadd.f32 %v245_v38, %v3852_v40  ;;  %v3854_v62 = vld [vmem:[#allocation39_spill] sm:$0xff]  ;;  %v3856_v48 = vld [vmem:[#allocation40_spill] sm:$0xff] }
  0x50   :  { %3845 = vst [vmem:[#allocation16_spill] sm:$0xff] %v1951_v27  ;;  %3847 = vst [vmem:[#allocation18_spill] sm:$0xff] %v1954_v30  ;;  %v1966_v45 = vadd.f32 %v246_v46, %v3854_v62  ;;  %v1969_v20 = vadd.f32 %v247_v15, %v3856_v48  ;;  %v3858_v52 = vld [vmem:[#allocation42_spill] sm:$0xff]  ;;  %v3860_v63 = vld [vmem:[#allocation43_spill] sm:$0xff] }
  0x51   :  { %3849 = vst [vmem:[#allocation19_spill] sm:$0xff] %v1957_v31  ;;  %3851 = vst [vmem:[#allocation20_spill] sm:$0xff] %v1960_v57  ;;  %v1972_v27 = vadd.f32 %v248_v35, %v3858_v52  ;;  %v1975_v30 = vadd.f32 %v249_v39, %v3860_v63  ;;  %v3862_v60 = vld [vmem:[#allocation44_spill] sm:$0xff]  ;;  %v3864_v14 = vld [vmem:[#allocation46_spill] sm:$0xff] }
  0x52   :  { %3853 = vst [vmem:[#allocation22_spill] sm:$0xff] %v1963_v42  ;;  %3855 = vst [vmem:[#allocation23_spill] sm:$0xff] %v1966_v45  ;;  %v1978_v31 = vadd.f32 %v250_v59, %v3862_v60  ;;  %v1981_v57 = vadd.f32 %v251_v25, %v3864_v14  ;;  %v3866_v38 = vld [vmem:[#allocation47_spill] sm:$0xff]  ;;  %v3868_v46 = vld [vmem:[#allocation48_spill] sm:$0xff] }
  0x53   :  { %3857 = vst [vmem:[#allocation24_spill] sm:$0xff] %v1969_v20  ;;  %3859 = vst [vmem:[#allocation26_spill] sm:$0xff] %v1972_v27  ;;  %v1984_v42 = vadd.f32 %v252_v8, %v3866_v38  ;;  %v1987_v45 = vadd.f32 %v253_v29, %v3868_v46  ;;  %v3870_v15 = vld [vmem:[#allocation50_spill] sm:$0xff]  ;;  %v3872_v35 = vld [vmem:[#allocation51_spill] sm:$0xff] }
  0x54   :  { %3861 = vst [vmem:[#allocation27_spill] sm:$0xff] %v1975_v30  ;;  %3863 = vst [vmem:[#allocation28_spill] sm:$0xff] %v1978_v31  ;;  %v1990_v20 = vadd.f32 %v254_v16, %v3870_v15  ;;  %v1993_v27 = vadd.f32 %v255_v17, %v3872_v35  ;;  %v3874_v39 = vld [vmem:[#allocation52_spill] sm:$0xff]  ;;  %v3876_v59 = vld [vmem:[#allocation54_spill] sm:$0xff]  ;;  %v2011_v16 = vadd.f32 %v261_v47, %v3802_v0 }
  0x55   :  { %3865 = vst [vmem:[#allocation30_spill] sm:$0xff] %v1981_v57  ;;  %3867 = vst [vmem:[#allocation31_spill] sm:$0xff] %v1984_v42  ;;  %v1996_v30 = vadd.f32 %v256_v19, %v3874_v39  ;;  %v1999_v31 = vadd.f32 %v257_v41, %v3876_v59  ;;  %v3878_v25 = vld [vmem:[#allocation55_spill] sm:$0xff]  ;;  %v3880_v8 = vld [vmem:[#allocation56_spill] sm:$0xff]  ;;  %v2014_v17 = vadd.f32 %v262_v12, %v3803_v6 }
  0x56   :  { %3869 = vst [vmem:[#allocation32_spill] sm:$0xff] %v1987_v45  ;;  %3871 = vst [vmem:[#allocation34_spill] sm:$0xff] %v1990_v20  ;;  %v2002_v57 = vadd.f32 %v258_v26, %v3878_v25  ;;  %v2005_v42 = vadd.f32 %v259_v9, %v3880_v8  ;;  %v3882_v29 = vld [vmem:[#allocation57_spill] sm:$0xff]  ;;  %v3886_v19 = vld [vmem:[#allocation60_spill] sm:$0xff] }
  0x57   :  { %3873 = vst [vmem:[#allocation35_spill] sm:$0xff] %v1993_v27  ;;  %3875 = vst [vmem:[#allocation36_spill] sm:$0xff] %v1996_v30  ;;  %v2008_v45 = vadd.f32 %v260_v43, %v3882_v29  ;;  %v2017_v30 = vadd.f32 %v263_v50, %v3886_v19  ;;  %v3888_v41 = vld [vmem:[#allocation61_spill] sm:$0xff]  ;;  %v3890_v26 = vld [vmem:[#allocation62_spill] sm:$0xff] }
  0x58   :  { %3877 = vst [vmem:[#allocation38_spill] sm:$0xff] %v1999_v31  ;;  %3879 = vst [vmem:[#allocation39_spill] sm:$0xff] %v2002_v57  ;;  %v2020_v31 = vadd.f32 %v264_v18, %v3888_v41  ;;  %v2023_v57 = vadd.f32 %v265_v49, %v3890_v26  ;;  %v3892_v9 = vld [vmem:[#allocation63_spill] sm:$0xff]  ;;  %v3894_v43 = vld [vmem:[#allocation64_spill] sm:$0xff] }
  0x59   :  { %3881 = vst [vmem:[#allocation40_spill] sm:$0xff] %v2005_v42  ;;  %3883 = vst [vmem:[#allocation42_spill] sm:$0xff] %v2008_v45  ;;  %v2026_v42 = vadd.f32 %v266_v24, %v3892_v9  ;;  %v2029_v45 = vadd.f32 %v267_v21, %v3894_v43  ;;  %v3896_v47 = vld [vmem:[#allocation65_spill] sm:$0xff]  ;;  %v3898_v12 = vld [vmem:[#allocation2_spill] sm:$0xff] }
  0x5a   :  { %3884 = vst [vmem:[#allocation43_spill] sm:$0xff] %v2011_v16  ;;  %3885 = vst [vmem:[#allocation44_spill] sm:$0xff] %v2014_v17  ;;  %v2032_v16 = vadd.f32 %v268_v56, %v3896_v47  ;;  %v2036_v17 = vsub.f32 %v3804_v13, %v3898_v12  ;;  %v3900_v50 = vld [vmem:[#allocation3_spill] sm:$0xff]  ;;  %v3904_v24 = vld [vmem:[#allocation5_spill] sm:$0xff] }
  0x5b   :  { %3887 = vst [vmem:[#allocation46_spill] sm:$0xff] %v2017_v30  ;;  %3889 = vst [vmem:[#allocation47_spill] sm:$0xff] %v2020_v31  ;;  %v2040_v18 = vsub.f32 %v3806_v7, %v3900_v50  ;;  %v3902_v31 = vld [vmem:[#allocation4_spill] sm:$0xff]  ;;  %v3906_v21 = vld [vmem:[#allocation6_spill] sm:$0xff]  ;;  %v2060_v50 = vsub.f32 %v3816_v51, %v3804_v13  ;;  %v2080_v13 = vsub.f32 %v3826_v32, %v3814_v58 }
  0x5c   :  { %3891 = vst [vmem:[#allocation48_spill] sm:$0xff] %v2023_v57  ;;  %3893 = vst [vmem:[#allocation50_spill] sm:$0xff] %v2026_v42  ;;  %v2044_v49 = vsub.f32 %v3808_v4, %v3902_v31  ;;  %v2048_v57 = vsub.f32 %v3810_v11, %v3904_v24  ;;  %v2052_v56 = vsub.f32 %v3812_v1, %v3906_v21 }
  0x5d   :  { %3895 = vst [vmem:[#allocation51_spill] sm:$0xff] %v2029_v45  ;;  %3897 = vst [vmem:[#allocation52_spill] sm:$0xff] %v2032_v16  ;;  %v3908_v16 = vld [vmem:[#allocation7_spill] sm:$0xff]  ;;  %v2064_v31 = vsub.f32 %v3818_v10, %v3806_v7  ;;  %v2068_v24 = vsub.f32 %v3820_v44, %v3808_v4  ;;  %v2072_v21 = vsub.f32 %v3822_v53, %v3810_v11 }
  0x5e   :  { %3899 = vst [vmem:[#allocation54_spill] sm:$0xff] %v2036_v17  ;;  %3901 = vst [vmem:[#allocation55_spill] sm:$0xff] %v2040_v18  ;;  %v2056_v12 = vsub.f32 %v3814_v58, %v3908_v16  ;;  %v2076_v16 = vsub.f32 %v3824_v2, %v3812_v1  ;;  %v2084_v7 = vsub.f32 %v3828_v5, %v3816_v51  ;;  %v440_v17 = vrot.slane %v2017_v30, 6 }
  0x5f   :  { %3903 = vst [vmem:[#allocation56_spill] sm:$0xff] %v2044_v49  ;;  %3905 = vst [vmem:[#allocation57_spill] sm:$0xff] %v2048_v57  ;;  %v2088_v4 = vsub.f32 %v3830_v22, %v3818_v10  ;;  %v2092_v11 = vsub.f32 %v3832_v36, %v3820_v44  ;;  %v2096_v1 = vsub.f32 %v3834_v61, %v3822_v53 }
  0x60   :  { %3907 = vst [vmem:[#allocation60_spill] sm:$0xff] %v2052_v56  ;;  %3909 = vst [vmem:[#allocation61_spill] sm:$0xff] %v2056_v12  ;;  %v2100_v58 = vsub.f32 %v3836_v54, %v3824_v2  ;;  %v2104_v51 = vsub.f32 %v3838_v34, %v3826_v32  ;;  %v2108_v10 = vsub.f32 %v3840_v3, %v3828_v5 }
  0x61   :  { %3910 = vst [vmem:[#allocation62_spill] sm:$0xff] %v2060_v50  ;;  %3911 = vst [vmem:[#allocation63_spill] sm:$0xff] %v2064_v31  ;;  %v2112_v44 = vsub.f32 %v3842_v33, %v3830_v22  ;;  %v2116_v53 = vsub.f32 %v3844_v37, %v3832_v36  ;;  %v2120_v2 = vsub.f32 %v3846_v23, %v3834_v61  ;;  %v3976_v50 = vld [vmem:[#allocation42_spill] sm:$0xff]  ;;  %v3977_v56 = vld [vmem:[#allocation43_spill] sm:$0xff] }
  0x62   :  { %3912 = vst [vmem:[#allocation64_spill] sm:$0xff] %v2068_v24  ;;  %3913 = vst [vmem:[#allocation65_spill] sm:$0xff] %v2072_v21  ;;  %v2124_v32 = vsub.f32 %v3848_v28, %v3836_v54  ;;  %v2128_v5 = vsub.f32 %v3850_v55, %v3838_v34  ;;  %v2132_v22 = vsub.f32 %v3852_v40, %v3840_v3  ;;  %v3975_v24 = vld [vmem:[#allocation39_spill] sm:$0xff]  ;;  %v437_v12 = vrot.slane %v3976_v50, 6 }
  0x63   :  { %3914 = vst [vmem:[#allocation2_spill] sm:$0xff] %v2076_v16  ;;  %3915 = vst [vmem:[#allocation3_spill] sm:$0xff] %v2080_v13  ;;  %v2136_v36 = vsub.f32 %v3854_v62, %v3842_v33  ;;  %v2140_v61 = vsub.f32 %v3856_v48, %v3844_v37  ;;  %v2144_v54 = vsub.f32 %v3858_v52, %v3846_v23  ;;  %v432_v13 = vrot.slane %v1993_v27, 6  ;;  %v3974_v16 = vld [vmem:[#allocation38_spill] sm:$0xff] }
  0x64   :  { %3916 = vst [vmem:[#allocation4_spill] sm:$0xff] %v2084_v7  ;;  %3917 = vst [vmem:[#allocation5_spill] sm:$0xff] %v2088_v4  ;;  %v2148_v34 = vsub.f32 %v3860_v63, %v3848_v28  ;;  %v2152_v3 = vsub.f32 %v3862_v60, %v3850_v55  ;;  %v2156_v33 = vsub.f32 %v3864_v14, %v3852_v40  ;;  %v431_v7 = vrot.slane %v1990_v20, 6 }
  0x65   :  { %3918 = vst [vmem:[#allocation6_spill] sm:$0xff] %v2092_v11  ;;  %3919 = vst [vmem:[#allocation7_spill] sm:$0xff] %v2096_v1  ;;  %v2160_v37 = vsub.f32 %v3866_v38, %v3854_v62  ;;  %v2164_v23 = vsub.f32 %v3868_v46, %v3856_v48  ;;  %v2168_v28 = vsub.f32 %v3870_v15, %v3858_v52  ;;  %v3973_v11 = vld [vmem:[#allocation31_spill] sm:$0xff]  ;;  %v434_v21 = vrot.slane %v3974_v16, 6 }
  0x66   :  { %3920 = vst [vmem:[#allocation66_spill] sm:$0xff] %v2100_v58  ;;  %3921 = vst [vmem:[#allocation67_spill] sm:$0xff] %v2104_v51  ;;  %v2172_v55 = vsub.f32 %v3872_v35, %v3860_v63  ;;  %v2176_v40 = vsub.f32 %v3874_v39, %v3862_v60  ;;  %v2180_v62 = vsub.f32 %v3876_v59, %v3864_v14  ;;  %v3945_v60 = vld [vmem:[#allocation21_spill] sm:$0xff]  ;;  %v3972_v58 = vld [vmem:[#allocation30_spill] sm:$0xff]  ;;  %v429_v4 = vrot.slane %v3973_v11, 6 }
  0x67   :  { %3922 = vst [vmem:[#allocation68_spill] sm:$0xff] %v2108_v10  ;;  %3923 = vst [vmem:[#allocation69_spill] sm:$0xff] %v2112_v44  ;;  %v2184_v48 = vsub.f32 %v3878_v25, %v3866_v38  ;;  %v2188_v52 = vsub.f32 %v3880_v8, %v3868_v46  ;;  %v2192_v63 = vsub.f32 %v3882_v29, %v3870_v15  ;;  %v3949_v46 = vld [vmem:[#allocation33_spill] sm:$0xff]  ;;  %v3971_v10 = vld [vmem:[#allocation27_spill] sm:$0xff]  ;;  %v428_v1 = vrot.slane %v3972_v58, 6 }
  0x68   :  { %3924 = vst [vmem:[#allocation70_spill] sm:$0xff] %v2116_v53  ;;  %3925 = vst [vmem:[#allocation71_spill] sm:$0xff] %v2120_v2  ;;  %v2198_v14 = vsub.f32 %v3802_v0, %v3872_v35  ;;  %v2202_v38 = vsub.f32 %v3803_v6, %v3874_v39  ;;  %v2208_v15 = vsub.f32 %v3886_v19, %v3876_v59  ;;  %v3956_v19 = vld [vmem:[#allocation41_spill] sm:$0xff]  ;;  %v3970_v53 = vld [vmem:[#allocation26_spill] sm:$0xff]  ;;  %v426_v51 = vrot.slane %v3971_v10, 6 }
  0x69   :  { %3926 = vst [vmem:[#allocation72_spill] sm:$0xff] %v2124_v32  ;;  %3927 = vst [vmem:[#allocation73_spill] sm:$0xff] %v2128_v5  ;;  %v2216_v35 = vsub.f32 %v3890_v26, %v3880_v8  ;;  %v2220_v39 = vsub.f32 %v3892_v9, %v3882_v29  ;;  %v2228_v59 = vsub.f32 %v3896_v47, %v3803_v6  ;;  %v3958_v8 = vld [vmem:[#allocation53_spill] sm:$0xff]  ;;  %v3960_v29 = vld [vmem:[#allocation8_spill] sm:$0xff]  ;;  %v425_v44 = vrot.slane %v3970_v53, 6 }
  0x6a   :  { %3928 = vst [vmem:[#allocation74_spill] sm:$0xff] %v2132_v22  ;;  %3929 = vst [vmem:[#allocation75_spill] sm:$0xff] %v2136_v36  ;;  %v407_v26 = vrot.slane %v3958_v8, 6  ;;  %v410_v9 = vrot.slane %v3960_v29, 6  ;;  %v3963_v6 = vld [vmem:[#allocation12_spill] sm:$0xff]  ;;  %v3968_v22 = vld [vmem:[#allocation22_spill] sm:$0xff]  ;;  %v430_v30 = vsel %vm397_vm0, %v428_v1, %v429_v4 }
  0x6b   :  { %3930 = vst [vmem:[#allocation76_spill] sm:$0xff] %v2140_v61  ;;  %3931 = vst [vmem:[#allocation77_spill] sm:$0xff] %v2144_v54  ;;  %v414_v47 = vrot.slane %v3963_v6, 6  ;;  %v3967_v61 = vld [vmem:[#allocation19_spill] sm:$0xff]  ;;  %v422_v5 = vrot.slane %v3968_v22, 6  ;;  %v435_v31 = vrot.slane %v3975_v24, 6  ;;  %v427_v53 = vsel %vm397_vm0, %v425_v44, %v426_v51 }
  0x6c   :  { %3932 = vst [vmem:[#allocation78_spill] sm:$0xff] %v2148_v34  ;;  %3933 = vst [vmem:[#allocation79_spill] sm:$0xff] %v2152_v3  ;;  %v3966_v34 = vld [vmem:[#allocation18_spill] sm:$0xff]  ;;  %v420_v36 = vrot.slane %v3967_v61, 6  ;;  %v3969_v32 = vld [vmem:[#allocation23_spill] sm:$0xff]  ;;  %v438_v57 = vrot.slane %v3977_v56, 6 }
  0x6d   :  { %3934 = vst [vmem:[#allocation80_spill] sm:$0xff] %v2156_v33  ;;  %3935 = vst [vmem:[#allocation81_spill] sm:$0xff] %v2160_v37  ;;  %v3965_v33 = vld [vmem:[#allocation15_spill] sm:$0xff]  ;;  %v419_v54 = vrot.slane %v3966_v34, 6  ;;  %v423_v2 = vrot.slane %v3969_v32, 6  ;;  %v443_v16 = vrot.slane %v2026_v42, 6  ;;  %v436_v32 = vsel %vm397_vm0, %v434_v21, %v435_v31 }
  0x6e   :  { %3936 = vst [vmem:[#allocation82_spill] sm:$0xff] %v2164_v23  ;;  %3937 = vst [vmem:[#allocation83_spill] sm:$0xff] %v2168_v28  ;;  %v417_v3 = vrot.slane %v3965_v33, 6  ;;  %v3978_v58 = vld [vmem:[#allocation47_spill] sm:$0xff]  ;;  %v444_v24 = vrot.slane %v2029_v45, 6  ;;  %v439_v22 = vsel %vm397_vm0, %v437_v12, %v438_v57  ;;  %v3981_v34 = vld [vmem:[#allocation25_spill] sm:$0xff] }
  0x6f   :  { %3938 = vst [vmem:[#allocation84_spill] sm:$0xff] %v2172_v55  ;;  %3939 = vst [vmem:[#allocation85_spill] sm:$0xff] %v2176_v40  ;;  %v3944_v55 = vld [vmem:[#allocation17_spill] sm:$0xff]  ;;  %v399_v40 = vrot.slane %v3945_v60, 6  ;;  %v441_v11 = vrot.slane %v3978_v58, 6  ;;  %v421_v56 = vsel %vm397_vm0, %v419_v54, %v420_v36  ;;  %v424_v10 = vsel %vm397_vm0, %v422_v5, %v423_v2 }
  0x70   :  { %3940 = vst [vmem:[#allocation86_spill] sm:$0xff] %v2180_v62  ;;  %3941 = vst [vmem:[#allocation87_spill] sm:$0xff] %v2184_v48  ;;  %v398_v28 = vrot.slane %v3944_v55, 6  ;;  %v3948_v48 = vld [vmem:[#allocation29_spill] sm:$0xff]  ;;  %v433_v58 = vsel %vm397_vm0, %v431_v7, %v432_v13 }
  0x71   :  { %3942 = vst [vmem:[#allocation88_spill] sm:$0xff] %v2188_v52  ;;  %3943 = vst [vmem:[#allocation89_spill] sm:$0xff] %v2192_v63  ;;  %v401_v62 = vrot.slane %v3948_v48, 6  ;;  %v402_v52 = vrot.slane %v3949_v46, 6  ;;  %v2212_v63 = vsub.f32 %v3888_v41, %v3878_v25  ;;  %v3957_v25 = vld [vmem:[#allocation45_spill] sm:$0xff]  ;;  %v442_v42 = vsel %vm397_vm0, %v440_v17, %v441_v11 }
  0x72   :  { %3946 = vst [vmem:[#allocation17_spill] sm:$0xff] %v2198_v14  ;;  %3947 = vst [vmem:[#allocation21_spill] sm:$0xff] %v2202_v38  ;;  %v2224_v38 = vsub.f32 %v3894_v43, %v3802_v0  ;;  %v405_v41 = vrot.slane %v3957_v25, 6  ;;  %v3961_v0 = vld [vmem:[#allocation9_spill] sm:$0xff]  ;;  %v2274_v45 = vsub.f32 %v3944_v55, %v398_v28  ;;  %v2280_v33 = vsub.f32 %v3981_v34, %v399_v40 }
  0x73   :  { %3950 = vst [vmem:[#allocation29_spill] sm:$0xff] %v2208_v15  ;;  %3951 = vst [vmem:[#allocation33_spill] sm:$0xff] %v2212_v63  ;;  %v404_v15 = vrot.slane %v3956_v19, 6  ;;  %v400_v63 = vsel %vm397_vm0, %v398_v28, %v399_v40  ;;  %v411_v43 = vrot.slane %v3961_v0, 6  ;;  %v2284_v6 = vsub.f32 %v3948_v48, %v401_v62  ;;  %v3985_v0 = vld [vmem:[#allocation37_spill] sm:$0xff]  ;;  %v3993_v48 = vld [vmem:[#allocation59_spill] sm:$0xff] }
  0x74   :  { %3952 = vst [vmem:[#allocation90_spill] sm:$0xff] %v2216_v35  ;;  %3953 = vst [vmem:[#allocation91_spill] sm:$0xff] %v2220_v39  ;;  %v3959_v35 = vld [vmem:[#allocation58_spill] sm:$0xff]  ;;  %v403_v39 = vsel %vm397_vm0, %v401_v62, %v402_v52  ;;  %v2277_v61 = vsub.f32 %v3945_v60, %v400_v63  ;;  %v2290_v29 = vsub.f32 %v3985_v0, %v402_v52  ;;  %v3989_v63 = vld [vmem:[#allocation49_spill] sm:$0xff] }
  0x75   :  { %3954 = vst [vmem:[#allocation92_spill] sm:$0xff] %v2224_v38  ;;  %3955 = vst [vmem:[#allocation93_spill] sm:$0xff] %v2228_v59  ;;  %v408_v14 = vrot.slane %v3959_v35, 6  ;;  %v3962_v38 = vld [vmem:[#allocation11_spill] sm:$0xff]  ;;  %v3964_v59 = vld [vmem:[#allocation14_spill] sm:$0xff]  ;;  %v406_v49 = vsel %vm397_vm0, %v404_v15, %v405_v41  ;;  %v412_v20 = vsel %vm397_vm0, %v410_v9, %v411_v43  ;;  %v2293_v28 = vsub.f32 %v3956_v19, %v404_v15 }
  0x76   :  { %v413_v23 = vrot.slane %v3962_v38, 6  ;;  %v416_v37 = vrot.slane %v3964_v59, 6  ;;  %3979 = vst [vmem:[#allocation41_spill] sm:$0xff] %v2274_v45  ;;  %3980 = vst [vmem:[#allocation45_spill] sm:$0xff] %v2277_v61  ;;  %v445_v59 = vsel %vm397_vm0, %v443_v16, %v444_v24  ;;  %v2287_v38 = vsub.f32 %v3949_v46, %v403_v39  ;;  %v3995_v52 = vld [vmem:[#allocation8_spill] sm:$0xff]  ;;  %v3997_v15 = vld [vmem:[#allocation9_spill] sm:$0xff] }
  0x77   :  { %v409_v18 = vsel %vm397_vm0, %v407_v26, %v408_v14  ;;  %3982 = vst [vmem:[#allocation53_spill] sm:$0xff] %v2280_v33  ;;  %3983 = vst [vmem:[#allocation58_spill] sm:$0xff] %v2284_v6  ;;  %v2296_v55 = vsub.f32 %v3957_v25, %v406_v49  ;;  %v2299_v34 = vsub.f32 %v3989_v63, %v405_v41  ;;  %v3999_v49 = vld [vmem:[#allocation10_spill] sm:$0xff]  ;;  %v4001_v25 = vld [vmem:[#allocation11_spill] sm:$0xff] }
  0x78   :  { %v415_v27 = vsel %vm397_vm0, %v413_v23, %v414_v47  ;;  %v418_v50 = vsel %vm397_vm0, %v416_v37, %v417_v3  ;;  %3984 = vst [vmem:[#allocation25_spill] sm:$0xff] %v2287_v38  ;;  %3986 = vst [vmem:[#allocation37_spill] sm:$0xff] %v2290_v29  ;;  %v2302_v40 = vsub.f32 %v3958_v8, %v407_v26  ;;  %v4003_v8 = vld [vmem:[#allocation12_spill] sm:$0xff]  ;;  %v4096_v29 = vld [vmem:[#allocation79_spill] sm:$0xff] }
  0x79   :  { %3987 = vst [vmem:[#allocation94_spill] sm:$0xff] %v2293_v28  ;;  %3988 = vst [vmem:[#allocation95_spill] sm:$0xff] %v2296_v55  ;;  %v2305_v62 = vsub.f32 %v3959_v35, %v409_v18  ;;  %v2308_v60 = vsub.f32 %v3993_v48, %v408_v14  ;;  %v2311_v46 = vsub.f32 %v3995_v52, %v410_v9  ;;  %v4005_v18 = vld [vmem:[#allocation13_spill] sm:$0xff]  ;;  %v4007_v14 = vld [vmem:[#allocation14_spill] sm:$0xff]  ;;  %v2498_v38 = vmul.f32 2.0, %v4096_v29 }
  0x7a   :  { %3990 = vst [vmem:[#allocation49_spill] sm:$0xff] %v2299_v34  ;;  %3991 = vst [vmem:[#allocation96_spill] sm:$0xff] %v2302_v40  ;;  %v2314_v39 = vsub.f32 %v3997_v15, %v412_v20  ;;  %v2317_v19 = vsub.f32 %v3999_v49, %v411_v43  ;;  %v2320_v41 = vsub.f32 %v4001_v25, %v413_v23  ;;  %v4009_v9 = vld [vmem:[#allocation15_spill] sm:$0xff]  ;;  %v4011_v20 = vld [vmem:[#allocation16_spill] sm:$0xff] }
  0x7b   :  { %3992 = vst [vmem:[#allocation97_spill] sm:$0xff] %v2305_v62  ;;  %3994 = vst [vmem:[#allocation59_spill] sm:$0xff] %v2308_v60  ;;  %v2323_v26 = vsub.f32 %v4003_v8, %v415_v27  ;;  %v2326_v35 = vsub.f32 %v4005_v18, %v414_v47  ;;  %v2329_v0 = vsub.f32 %v4007_v14, %v416_v37  ;;  %v4013_v43 = vld [vmem:[#allocation18_spill] sm:$0xff]  ;;  %v4015_v23 = vld [vmem:[#allocation19_spill] sm:$0xff] }
  0x7c   :  { %3996 = vst [vmem:[#allocation8_spill] sm:$0xff] %v2311_v46  ;;  %3998 = vst [vmem:[#allocation9_spill] sm:$0xff] %v2314_v39  ;;  %v2332_v63 = vsub.f32 %v4009_v9, %v418_v50  ;;  %v2335_v48 = vsub.f32 %v4011_v20, %v417_v3  ;;  %v2338_v52 = vsub.f32 %v4013_v43, %v419_v54  ;;  %v4017_v27 = vld [vmem:[#allocation20_spill] sm:$0xff]  ;;  %v4019_v47 = vld [vmem:[#allocation22_spill] sm:$0xff] }
  0x7d   :  { %4000 = vst [vmem:[#allocation10_spill] sm:$0xff] %v2317_v19  ;;  %4002 = vst [vmem:[#allocation11_spill] sm:$0xff] %v2320_v41  ;;  %v2341_v15 = vsub.f32 %v4015_v23, %v421_v56  ;;  %v2344_v49 = vsub.f32 %v4017_v27, %v420_v36  ;;  %v2347_v25 = vsub.f32 %v4019_v47, %v422_v5  ;;  %v4021_v37 = vld [vmem:[#allocation23_spill] sm:$0xff]  ;;  %v4023_v50 = vld [vmem:[#allocation24_spill] sm:$0xff] }
  0x7e   :  { %4004 = vst [vmem:[#allocation12_spill] sm:$0xff] %v2323_v26  ;;  %4006 = vst [vmem:[#allocation13_spill] sm:$0xff] %v2326_v35  ;;  %v2350_v8 = vsub.f32 %v4021_v37, %v424_v10  ;;  %v2353_v18 = vsub.f32 %v4023_v50, %v423_v2  ;;  %v4025_v3 = vld [vmem:[#allocation26_spill] sm:$0xff]  ;;  %v4027_v54 = vld [vmem:[#allocation27_spill] sm:$0xff] }
  0x7f   :  { %4008 = vst [vmem:[#allocation14_spill] sm:$0xff] %v2329_v0  ;;  %4010 = vst [vmem:[#allocation15_spill] sm:$0xff] %v2332_v63  ;;  %v2356_v14 = vsub.f32 %v4025_v3, %v425_v44  ;;  %v2359_v9 = vsub.f32 %v4027_v54, %v427_v53  ;;  %v4029_v56 = vld [vmem:[#allocation28_spill] sm:$0xff]  ;;  %v4031_v36 = vld [vmem:[#allocation30_spill] sm:$0xff] }
  0x80   :  { %4012 = vst [vmem:[#allocation16_spill] sm:$0xff] %v2335_v48  ;;  %4014 = vst [vmem:[#allocation18_spill] sm:$0xff] %v2338_v52  ;;  %v2362_v20 = vsub.f32 %v4029_v56, %v426_v51  ;;  %v2365_v43 = vsub.f32 %v4031_v36, %v428_v1  ;;  %v4033_v5 = vld [vmem:[#allocation31_spill] sm:$0xff]  ;;  %v4035_v10 = vld [vmem:[#allocation32_spill] sm:$0xff] }
  0x81   :  { %4016 = vst [vmem:[#allocation19_spill] sm:$0xff] %v2341_v15  ;;  %4018 = vst [vmem:[#allocation20_spill] sm:$0xff] %v2344_v49  ;;  %v2368_v23 = vsub.f32 %v4033_v5, %v430_v30  ;;  %v2371_v27 = vsub.f32 %v4035_v10, %v429_v4  ;;  %v4037_v2 = vld [vmem:[#allocation34_spill] sm:$0xff]  ;;  %v4039_v44 = vld [vmem:[#allocation35_spill] sm:$0xff] }
  0x82   :  { %4020 = vst [vmem:[#allocation22_spill] sm:$0xff] %v2347_v25  ;;  %4022 = vst [vmem:[#allocation23_spill] sm:$0xff] %v2350_v8  ;;  %v2374_v47 = vsub.f32 %v4037_v2, %v431_v7  ;;  %v2377_v37 = vsub.f32 %v4039_v44, %v433_v58  ;;  %v4041_v53 = vld [vmem:[#allocation36_spill] sm:$0xff]  ;;  %v4043_v51 = vld [vmem:[#allocation38_spill] sm:$0xff] }
  0x83   :  { %4024 = vst [vmem:[#allocation24_spill] sm:$0xff] %v2353_v18  ;;  %4026 = vst [vmem:[#allocation26_spill] sm:$0xff] %v2356_v14  ;;  %v2380_v50 = vsub.f32 %v4041_v53, %v432_v13  ;;  %v2383_v3 = vsub.f32 %v4043_v51, %v434_v21  ;;  %v4045_v1 = vld [vmem:[#allocation39_spill] sm:$0xff]  ;;  %v4047_v30 = vld [vmem:[#allocation40_spill] sm:$0xff] }
  0x84   :  { %4028 = vst [vmem:[#allocation27_spill] sm:$0xff] %v2359_v9  ;;  %4030 = vst [vmem:[#allocation28_spill] sm:$0xff] %v2362_v20  ;;  %v2386_v54 = vsub.f32 %v4045_v1, %v436_v32  ;;  %v2389_v56 = vsub.f32 %v4047_v30, %v435_v31  ;;  %v4049_v4 = vld [vmem:[#allocation42_spill] sm:$0xff]  ;;  %v4051_v7 = vld [vmem:[#allocation43_spill] sm:$0xff] }
  0x85   :  { %4032 = vst [vmem:[#allocation30_spill] sm:$0xff] %v2365_v43  ;;  %4034 = vst [vmem:[#allocation31_spill] sm:$0xff] %v2368_v23  ;;  %v2392_v36 = vsub.f32 %v4049_v4, %v437_v12  ;;  %v2395_v5 = vsub.f32 %v4051_v7, %v439_v22  ;;  %v4053_v58 = vld [vmem:[#allocation44_spill] sm:$0xff]  ;;  %v4055_v13 = vld [vmem:[#allocation46_spill] sm:$0xff] }
  0x86   :  { %4036 = vst [vmem:[#allocation32_spill] sm:$0xff] %v2371_v27  ;;  %4038 = vst [vmem:[#allocation34_spill] sm:$0xff] %v2374_v47  ;;  %v2398_v10 = vsub.f32 %v4053_v58, %v438_v57  ;;  %v2401_v2 = vsub.f32 %v4055_v13, %v440_v17  ;;  %v4057_v21 = vld [vmem:[#allocation47_spill] sm:$0xff]  ;;  %v4059_v32 = vld [vmem:[#allocation48_spill] sm:$0xff] }
  0x87   :  { %4040 = vst [vmem:[#allocation35_spill] sm:$0xff] %v2377_v37  ;;  %4042 = vst [vmem:[#allocation36_spill] sm:$0xff] %v2380_v50  ;;  %v2404_v44 = vsub.f32 %v4057_v21, %v442_v42  ;;  %v2407_v53 = vsub.f32 %v4059_v32, %v441_v11  ;;  %v4061_v31 = vld [vmem:[#allocation50_spill] sm:$0xff]  ;;  %v4063_v12 = vld [vmem:[#allocation51_spill] sm:$0xff] }
  0x88   :  { %4044 = vst [vmem:[#allocation38_spill] sm:$0xff] %v2383_v3  ;;  %4046 = vst [vmem:[#allocation39_spill] sm:$0xff] %v2386_v54  ;;  %v2410_v51 = vsub.f32 %v4061_v31, %v443_v16  ;;  %v2413_v1 = vsub.f32 %v4063_v12, %v445_v59  ;;  %v4065_v22 = vld [vmem:[#allocation52_spill] sm:$0xff]  ;;  %v4067_v57 = vld [vmem:[#allocation54_spill] sm:$0xff] }
  0x89   :  { %4048 = vst [vmem:[#allocation40_spill] sm:$0xff] %v2389_v56  ;;  %4050 = vst [vmem:[#allocation42_spill] sm:$0xff] %v2392_v36  ;;  %v2416_v30 = vsub.f32 %v4065_v22, %v444_v24  ;;  %v542_v4 = vmul.f32 2.0, %v4067_v57  ;;  %v4068_v7 = vld [vmem:[#allocation55_spill] sm:$0xff]  ;;  %v4069_v58 = vld [vmem:[#allocation56_spill] sm:$0xff] }
  0x8a   :  { %4052 = vst [vmem:[#allocation43_spill] sm:$0xff] %v2395_v5  ;;  %4054 = vst [vmem:[#allocation44_spill] sm:$0xff] %v2398_v10  ;;  %v543_v17 = vmul.f32 2.0, %v4068_v7  ;;  %v544_v13 = vmul.f32 2.0, %v4069_v58  ;;  %v4070_v42 = vld [vmem:[#allocation57_spill] sm:$0xff]  ;;  %v4073_v31 = vld [vmem:[#allocation62_spill] sm:$0xff] }
  0x8b   :  { %4056 = vst [vmem:[#allocation46_spill] sm:$0xff] %v2401_v2  ;;  %4058 = vst [vmem:[#allocation47_spill] sm:$0xff] %v2404_v44  ;;  %v545_v21 = vmul.f32 2.0, %v4070_v42  ;;  %v4071_v44 = vld [vmem:[#allocation60_spill] sm:$0xff]  ;;  %v4072_v32 = vld [vmem:[#allocation61_spill] sm:$0xff]  ;;  %v2429_v59 = vmul.f32 2.0, %v4073_v31 }
  0x8c   :  { %4060 = vst [vmem:[#allocation48_spill] sm:$0xff] %v2407_v53  ;;  %4062 = vst [vmem:[#allocation50_spill] sm:$0xff] %v2410_v51  ;;  %v2423_v11 = vmul.f32 2.0, %v4071_v44  ;;  %v2426_v16 = vmul.f32 2.0, %v4072_v32  ;;  %v4074_v12 = vld [vmem:[#allocation63_spill] sm:$0xff]  ;;  %v4075_v22 = vld [vmem:[#allocation64_spill] sm:$0xff] }
  0x8d   :  { %4064 = vst [vmem:[#allocation51_spill] sm:$0xff] %v2413_v1  ;;  %4066 = vst [vmem:[#allocation52_spill] sm:$0xff] %v2416_v30  ;;  %v2432_v24 = vmul.f32 2.0, %v4074_v12  ;;  %v2435_v30 = vmul.f32 2.0, %v4075_v22  ;;  %v4076_v1 = vld [vmem:[#allocation65_spill] sm:$0xff]  ;;  %v4077_v53 = vld [vmem:[#allocation2_spill] sm:$0xff] }
  0x8e   :  { %v2438_v51 = vmul.f32 2.0, %v4076_v1  ;;  %v2441_v2 = vmul.f32 2.0, %v4077_v53  ;;  %v4078_v10 = vld [vmem:[#allocation3_spill] sm:$0xff]  ;;  %v4079_v36 = vld [vmem:[#allocation4_spill] sm:$0xff]  ;;  %v4080_v54 = vld [vmem:[#allocation5_spill] sm:$0xff] }
  0x8f   :  { %v2444_v5 = vmul.f32 2.0, %v4078_v10  ;;  %v2447_v56 = vmul.f32 2.0, %v4079_v36  ;;  %v2450_v3 = vmul.f32 2.0, %v4080_v54  ;;  %v4081_v50 = vld [vmem:[#allocation6_spill] sm:$0xff]  ;;  %v4082_v47 = vld [vmem:[#allocation7_spill] sm:$0xff]  ;;  %v4085_v14 = vld [vmem:[#allocation68_spill] sm:$0xff] }
  0x90   :  { %v2453_v37 = vmul.f32 2.0, %v4081_v50  ;;  %v2456_v27 = vmul.f32 2.0, %v4082_v47  ;;  %v4083_v23 = vld [vmem:[#allocation66_spill] sm:$0xff]  ;;  %v4084_v20 = vld [vmem:[#allocation67_spill] sm:$0xff]  ;;  %v2465_v18 = vmul.f32 2.0, %v4085_v14  ;;  %v4086_v8 = vld [vmem:[#allocation69_spill] sm:$0xff] }
  0x91   :  { %v2459_v43 = vmul.f32 2.0, %v4083_v23  ;;  %v2462_v9 = vmul.f32 2.0, %v4084_v20  ;;  %v2468_v25 = vmul.f32 2.0, %v4086_v8  ;;  %v4087_v49 = vld [vmem:[#allocation70_spill] sm:$0xff]  ;;  %v4088_v52 = vld [vmem:[#allocation71_spill] sm:$0xff]  ;;  %v4089_v63 = vld [vmem:[#allocation72_spill] sm:$0xff] }
  0x92   :  { %v2471_v15 = vmul.f32 2.0, %v4087_v49  ;;  %v2474_v48 = vmul.f32 2.0, %v4088_v52  ;;  %v2477_v0 = vmul.f32 2.0, %v4089_v63  ;;  %v4090_v35 = vld [vmem:[#allocation73_spill] sm:$0xff]  ;;  %v4091_v41 = vld [vmem:[#allocation74_spill] sm:$0xff]  ;;  %v4092_v39 = vld [vmem:[#allocation75_spill] sm:$0xff] }
  0x93   :  { %v2480_v26 = vmul.f32 2.0, %v4090_v35  ;;  %v2483_v19 = vmul.f32 2.0, %v4091_v41  ;;  %v2486_v46 = vmul.f32 2.0, %v4092_v39  ;;  %v4093_v60 = vld [vmem:[#allocation76_spill] sm:$0xff]  ;;  %v4094_v40 = vld [vmem:[#allocation77_spill] sm:$0xff]  ;;  %v4095_v55 = vld [vmem:[#allocation78_spill] sm:$0xff] }
  0x94   :  { %v2489_v62 = vmul.f32 2.0, %v4093_v60  ;;  %v2492_v34 = vmul.f32 2.0, %v4094_v40  ;;  %v2495_v28 = vmul.f32 2.0, %v4095_v55  ;;  %v4097_v6 = vld [vmem:[#allocation80_spill] sm:$0xff]  ;;  %v4098_v61 = vld [vmem:[#allocation81_spill] sm:$0xff]  ;;  %v4099_v35 = vld [vmem:[#allocation82_spill] sm:$0xff] }
  0x95   :  { %v2501_v33 = vmul.f32 2.0, %v4097_v6  ;;  %v2504_v45 = vmul.f32 2.0, %v4098_v61  ;;  %v2507_v49 = vmul.f32 2.0, %v4099_v35  ;;  %v4100_v60 = vld [vmem:[#allocation83_spill] sm:$0xff]  ;;  %v4101_v50 = vld [vmem:[#allocation84_spill] sm:$0xff]  ;;  %v4102_v22 = vld [vmem:[#allocation85_spill] sm:$0xff] }
  0x96   :  { %v2510_v20 = vmul.f32 2.0, %v4100_v60  ;;  %v2513_v10 = vmul.f32 2.0, %v4101_v50  ;;  %v2516_v32 = vmul.f32 2.0, %v4102_v22  ;;  %v4103_v29 = vld [vmem:[#allocation86_spill] sm:$0xff]  ;;  %v4104_v6 = vld [vmem:[#allocation87_spill] sm:$0xff]  ;;  %v4105_v61 = vld [vmem:[#allocation88_spill] sm:$0xff] }
  0x97   :  { %v2519_v58 = vmul.f32 2.0, %v4103_v29  ;;  %v2522_v55 = vmul.f32 2.0, %v4104_v6  ;;  %v2525_v40 = vmul.f32 2.0, %v4105_v61  ;;  %v639_v35 = vrot.slane %v542_v4, 1  ;;  %v4106_v60 = vld [vmem:[#allocation89_spill] sm:$0xff]  ;;  %v4111_v4 = vld [vmem:[#allocation90_spill] sm:$0xff] }
  0x98   :  { %v640_v39 = vrot.slane %v543_v17, 1  ;;  %v642_v41 = vrot.slane %v544_v13, 1  ;;  %v2528_v63 = vmul.f32 2.0, %v4106_v60  ;;  %v4107_v50 = vld [vmem:[#allocation17_spill] sm:$0xff]  ;;  %v644_v22 = vrot.slane %v545_v21, 1  ;;  %v4112_v13 = vld [vmem:[#allocation91_spill] sm:$0xff] }
  0x99   :  { %v2531_v52 = vmul.f32 2.0, %v4107_v50  ;;  %v645_v8 = vrot.slane %v2423_v11, 1  ;;  %v4108_v29 = vld [vmem:[#allocation21_spill] sm:$0xff]  ;;  %v2544_v17 = vmul.f32 2.0, %v4111_v4  ;;  %v2547_v60 = vmul.f32 2.0, %v4112_v13  ;;  %v4113_v50 = vld [vmem:[#allocation92_spill] sm:$0xff] }
  0x9a   :  { %v2535_v14 = vmul.f32 2.0, %v4108_v29  ;;  %v4109_v6 = vld [vmem:[#allocation29_spill] sm:$0xff]  ;;  %v2550_v54 = vmul.f32 2.0, %v4113_v50  ;;  %v647_v29 = vrot.slane %v2426_v16, 1  ;;  %v649_v4 = vrot.slane %v2429_v59, 1 }
  0x9b   :  { %v2538_v23 = vmul.f32 2.0, %v4109_v6  ;;  %v4110_v61 = vld [vmem:[#allocation33_spill] sm:$0xff]  ;;  %v2557_v6 = vsel %vm638_vm1, %v639_v35, %v640_v39  ;;  %v650_v36 = vrot.slane %v2432_v24, 1  ;;  %v2565_v13 = vsel %vm638_vm1, %v644_v22, %v645_v8 }
  0x9c   :  { %v2541_v47 = vmul.f32 2.0, %v4110_v61  ;;  %v4114_v21 = vld [vmem:[#allocation93_spill] sm:$0xff]  ;;  %v2560_v61 = vsel %vm638_vm1, %v640_v39, %v642_v41  ;;  %v652_v50 = vrot.slane %v2435_v30, 1  ;;  %v655_v53 = vrot.slane %v2441_v2, 1 }
  0x9d   :  { %v2553_v11 = vmul.f32 2.0, %v4114_v21  ;;  %v654_v21 = vrot.slane %v2438_v51, 1  ;;  %v657_v16 = vrot.slane %v2444_v5, 1  ;;  %v659_v35 = vrot.slane %v2447_v56, 1 }
  0x9e   :  { %v660_v39 = vrot.slane %v2450_v3, 1  ;;  %v662_v41 = vrot.slane %v2453_v37, 1  ;;  %v664_v59 = vrot.slane %v2456_v27, 1  ;;  %v665_v24 = vrot.slane %v2459_v43, 1 }
  0x9f   :  { %v667_v22 = vrot.slane %v2462_v9, 1  ;;  %v669_v30 = vrot.slane %v2465_v18, 1  ;;  %v670_v51 = vrot.slane %v2468_v25, 1  ;;  %v672_v2 = vrot.slane %v2471_v15, 1 }
  0xa0   :  { %v674_v5 = vrot.slane %v2474_v48, 1  ;;  %v675_v56 = vrot.slane %v2477_v0, 1  ;;  %v648_v3 = vsel %vm638_vm1, %v645_v8, %v647_v29  ;;  %v651_v37 = vsel %vm638_vm1, %v649_v4, %v650_v36 }
  0xa1   :  { %v653_v27 = vsel %vm638_vm1, %v650_v36, %v652_v50  ;;  %v677_v43 = vrot.slane %v2480_v26, 1  ;;  %v656_v9 = vsel %vm638_vm1, %v654_v21, %v655_v53  ;;  %v658_v18 = vsel %vm638_vm1, %v655_v53, %v657_v16 }
  0xa2   :  { %v679_v25 = vrot.slane %v2483_v19, 1  ;;  %v680_v15 = vrot.slane %v2486_v46, 1  ;;  %v661_v48 = vsel %vm638_vm1, %v659_v35, %v660_v39  ;;  %v663_v0 = vsel %vm638_vm1, %v660_v39, %v662_v41 }
  0xa3   :  { %v666_v29 = vsel %vm638_vm1, %v664_v59, %v665_v24  ;;  %v668_v8 = vsel %vm638_vm1, %v665_v24, %v667_v22  ;;  %v671_v50 = vsel %vm638_vm1, %v669_v30, %v670_v51  ;;  %v673_v26 = vsel %vm638_vm1, %v670_v51, %v672_v2 }
  0xa4   :  { %v676_v36 = vsel %vm638_vm1, %v674_v5, %v675_v56  ;;  %v682_v53 = vrot.slane %v2489_v62, 1  ;;  %v678_v19 = vsel %vm638_vm1, %v675_v56, %v677_v43  ;;  %v684_v46 = vrot.slane %v2492_v34, 1 }
  0xa5   :  { %v685_v4 = vrot.slane %v2495_v28, 1  ;;  %v687_v21 = vrot.slane %v2498_v38, 1  ;;  %v681_v16 = vsel %vm638_vm1, %v679_v25, %v680_v15  ;;  %v689_v35 = vrot.slane %v2501_v33, 1 }
  0xa6   :  { %v690_v39 = vrot.slane %v2504_v45, 1  ;;  %v692_v41 = vrot.slane %v2507_v49, 1  ;;  %v694_v59 = vrot.slane %v2510_v20, 1  ;;  %v695_v62 = vrot.slane %v2513_v10, 1 }
  0xa7   :  { %v697_v24 = vrot.slane %v2516_v32, 1  ;;  %v699_v34 = vrot.slane %v2519_v58, 1  ;;  %v700_v28 = vrot.slane %v2522_v55, 1  ;;  %v702_v38 = vrot.slane %v2525_v40, 1 }
  0xa8   :  { %v704_v22 = vrot.slane %v2528_v63, 1  ;;  %v705_v33 = vrot.slane %v2531_v52, 1  ;;  %v707_v45 = vrot.slane %v2535_v14, 1  ;;  %v709_v49 = vrot.slane %v2538_v23, 1 }
  0xa9   :  { %v710_v20 = vrot.slane %v2541_v47, 1  ;;  %v712_v10 = vrot.slane %v2544_v17, 1  ;;  %v683_v32 = vsel %vm638_vm1, %v680_v15, %v682_v53  ;;  %v686_v58 = vsel %vm638_vm1, %v684_v46, %v685_v4 }
  0xaa   :  { %v714_v55 = vrot.slane %v2547_v60, 1  ;;  %v715_v40 = vrot.slane %v2550_v54, 1  ;;  %v688_v63 = vsel %vm638_vm1, %v685_v4, %v687_v21  ;;  %v691_v52 = vsel %vm638_vm1, %v689_v35, %v690_v39  ;;  %v4116_v35 = vld [vmem:[#allocation4_spill] sm:$0xff] }
  0xab   :  { %v693_v14 = vsel %vm638_vm1, %v690_v39, %v692_v41  ;;  %v717_v23 = vrot.slane %v2553_v11, 1  ;;  %v696_v47 = vsel %vm638_vm1, %v694_v59, %v695_v62  ;;  %v698_v17 = vsel %vm638_vm1, %v695_v62, %v697_v24  ;;  %v4117_v39 = vld [vmem:[#allocation5_spill] sm:$0xff] }
  0xac   :  { %v701_v30 = vsel %vm638_vm1, %v699_v34, %v700_v28  ;;  %v703_v51 = vsel %vm638_vm1, %v700_v28, %v702_v38  ;;  %v706_v60 = vsel %vm638_vm1, %v704_v22, %v705_v33  ;;  %v708_v54 = vsel %vm638_vm1, %v705_v33, %v707_v45 }
  0xad   :  { %v711_v2 = vsel %vm638_vm1, %v709_v49, %v710_v20  ;;  %v713_v5 = vsel %vm638_vm1, %v710_v20, %v712_v10  ;;  %v716_v56 = vsel %vm638_vm1, %v714_v55, %v715_v40  ;;  %v2637_v11 = vadd.f32 %v2557_v6, %v4067_v57 }
  0xae   :  { %v2641_v43 = vadd.f32 %v2560_v61, %v4068_v7  ;;  %v2645_v25 = vadd.f32 %v2565_v13, %v4070_v42  ;;  %v718_v15 = vsel %vm638_vm1, %v715_v40, %v717_v23  ;;  %v2649_v53 = vadd.f32 %v648_v3, %v4071_v44  ;;  %v4115_v61 = vld [vmem:[#allocation2_spill] sm:$0xff]  ;;  %v4118_v3 = vld [vmem:[#allocation7_spill] sm:$0xff]  ;;  %v4140_v40 = vld [vmem:[#allocation56_spill] sm:$0xff] }
  0xaf   :  { %v2652_v46 = vadd.f32 %v651_v37, %v4073_v31  ;;  %v2655_v4 = vadd.f32 %v653_v27, %v4074_v12  ;;  %v2658_v6 = vadd.f32 %v656_v9, %v4076_v1  ;;  %v2661_v21 = vadd.f32 %v658_v18, %v4115_v61  ;;  %v4119_v37 = vld [vmem:[#allocation66_spill] sm:$0xff]  ;;  %v4120_v27 = vld [vmem:[#allocation68_spill] sm:$0xff]  ;;  %v4121_v9 = vld [vmem:[#allocation69_spill] sm:$0xff] }
  0xb0   :  { %v2664_v13 = vadd.f32 %v661_v48, %v4116_v35  ;;  %v2667_v41 = vadd.f32 %v663_v0, %v4117_v39  ;;  %v2670_v59 = vadd.f32 %v666_v29, %v4118_v3  ;;  %v2673_v62 = vadd.f32 %v668_v8, %v4119_v37  ;;  %v4122_v18 = vld [vmem:[#allocation71_spill] sm:$0xff]  ;;  %v4124_v48 = vld [vmem:[#allocation72_spill] sm:$0xff]  ;;  %v4126_v0 = vld [vmem:[#allocation74_spill] sm:$0xff] }
  0xb1   :  { %v2676_v24 = vadd.f32 %v671_v50, %v4120_v27  ;;  %v2679_v34 = vadd.f32 %v673_v26, %v4121_v9  ;;  %v2682_v28 = vadd.f32 %v676_v36, %v4122_v18  ;;  %v2685_v38 = vadd.f32 %v678_v19, %v4124_v48  ;;  %v4128_v29 = vld [vmem:[#allocation75_spill] sm:$0xff]  ;;  %v4130_v8 = vld [vmem:[#allocation77_spill] sm:$0xff]  ;;  %v4132_v50 = vld [vmem:[#allocation78_spill] sm:$0xff] }
  0xb2   :  { %v2688_v22 = vadd.f32 %v681_v16, %v4126_v0  ;;  %v2691_v33 = vadd.f32 %v683_v32, %v4128_v29  ;;  %v2694_v45 = vadd.f32 %v686_v58, %v4130_v8  ;;  %v2697_v49 = vadd.f32 %v688_v63, %v4132_v50  ;;  %v4134_v26 = vld [vmem:[#allocation80_spill] sm:$0xff]  ;;  %v4136_v36 = vld [vmem:[#allocation81_spill] sm:$0xff]  ;;  %v4138_v19 = vld [vmem:[#allocation83_spill] sm:$0xff] }
  0xb3   :  { %4123 = vst [vmem:[#allocation54_spill] sm:$0xff] %v2682_v28  ;;  %4125 = vst [vmem:[#allocation55_spill] sm:$0xff] %v2685_v38  ;;  %v2700_v20 = vadd.f32 %v691_v52, %v4134_v26  ;;  %v2703_v10 = vadd.f32 %v693_v14, %v4136_v36  ;;  %v2706_v55 = vadd.f32 %v696_v47, %v4138_v19  ;;  %v832_v16 = vrot.slane %v4067_v57, 2  ;;  %v4141_v58 = vld [vmem:[#allocation84_spill] sm:$0xff]  ;;  %v4143_v63 = vld [vmem:[#allocation86_spill] sm:$0xff] }
  0xb4   :  { %4127 = vst [vmem:[#allocation57_spill] sm:$0xff] %v2688_v22  ;;  %4129 = vst [vmem:[#allocation60_spill] sm:$0xff] %v2691_v33  ;;  %v833_v32 = vrot.slane %v4068_v7, 2  ;;  %v835_v23 = vrot.slane %v4140_v40, 2  ;;  %v837_v52 = vrot.slane %v4070_v42, 2  ;;  %v838_v14 = vrot.slane %v4071_v44, 2 }
  0xb5   :  { %4131 = vst [vmem:[#allocation62_spill] sm:$0xff] %v2694_v45  ;;  %4133 = vst [vmem:[#allocation63_spill] sm:$0xff] %v2697_v49  ;;  %v2712_v45 = vadd.f32 %v698_v17, %v4141_v58  ;;  %v2715_v49 = vadd.f32 %v701_v30, %v4143_v63  ;;  %v4147_v47 = vld [vmem:[#allocation89_spill] sm:$0xff]  ;;  %v4155_v30 = vld [vmem:[#allocation91_spill] sm:$0xff] }
  0xb6   :  { %4135 = vst [vmem:[#allocation65_spill] sm:$0xff] %v2700_v20  ;;  %4137 = vst [vmem:[#allocation2_spill] sm:$0xff] %v2703_v10  ;;  %v4145_v10 = vld [vmem:[#allocation87_spill] sm:$0xff]  ;;  %v4149_v57 = vld [vmem:[#allocation17_spill] sm:$0xff] }
  0xb7   :  { %4139 = vst [vmem:[#allocation4_spill] sm:$0xff] %v2706_v55  ;;  %4142 = vst [vmem:[#allocation5_spill] sm:$0xff] %v2712_v45  ;;  %v2720_v20 = vadd.f32 %v703_v51, %v4145_v10  ;;  %v2723_v55 = vadd.f32 %v706_v60, %v4147_v47  ;;  %v2726_v7 = vadd.f32 %v708_v54, %v4149_v57  ;;  %v4151_v40 = vld [vmem:[#allocation29_spill] sm:$0xff]  ;;  %v4157_v42 = vld [vmem:[#allocation92_spill] sm:$0xff] }
  0xb8   :  { %4144 = vst [vmem:[#allocation7_spill] sm:$0xff] %v2715_v49  ;;  %v2729_v33 = vadd.f32 %v711_v2, %v4151_v40  ;;  %v4153_v17 = vld [vmem:[#allocation33_spill] sm:$0xff]  ;;  %v2735_v49 = vadd.f32 %v716_v56, %v4155_v30  ;;  %v2738_v44 = vadd.f32 %v718_v15, %v4157_v42  ;;  %v2742_v60 = vsel %vm831_vm2, %v832_v16, %v833_v32  ;;  %v4160_v56 = vld [vmem:[#allocation64_spill] sm:$0xff]  ;;  %v4164_v22 = vld [vmem:[#allocation70_spill] sm:$0xff] }
  0xb9   :  { %4146 = vst [vmem:[#allocation66_spill] sm:$0xff] %v2720_v20  ;;  %4148 = vst [vmem:[#allocation68_spill] sm:$0xff] %v2723_v55  ;;  %v2732_v45 = vadd.f32 %v713_v5, %v4153_v17  ;;  %v4159_v51 = vld [vmem:[#allocation61_spill] sm:$0xff]  ;;  %v2745_v54 = vsel %vm831_vm2, %v833_v32, %v835_v23  ;;  %v842_v2 = vrot.slane %v4073_v31, 2  ;;  %v2750_v5 = vsel %vm831_vm2, %v837_v52, %v838_v14  ;;  %v4162_v23 = vld [vmem:[#allocation6_spill] sm:$0xff] }
  0xba   :  { %4150 = vst [vmem:[#allocation69_spill] sm:$0xff] %v2726_v7  ;;  %4152 = vst [vmem:[#allocation71_spill] sm:$0xff] %v2729_v33  ;;  %v840_v20 = vrot.slane %v4159_v51, 2  ;;  %v843_v33 = vrot.slane %v4074_v12, 2  ;;  %v847_v15 = vrot.slane %v4076_v1, 2  ;;  %v4161_v51 = vld [vmem:[#allocation3_spill] sm:$0xff] }
  0xbb   :  { %4154 = vst [vmem:[#allocation72_spill] sm:$0xff] %v2732_v45  ;;  %4156 = vst [vmem:[#allocation74_spill] sm:$0xff] %v2735_v49  ;;  %v845_v49 = vrot.slane %v4160_v56, 2  ;;  %v850_v45 = vrot.slane %v4161_v51, 2  ;;  %v852_v16 = vrot.slane %v4116_v35, 2  ;;  %v853_v32 = vrot.slane %v4117_v39, 2 }
  0xbc   :  { %4158 = vst [vmem:[#allocation75_spill] sm:$0xff] %v2738_v44  ;;  %v848_v44 = vrot.slane %v4115_v61, 2  ;;  %v855_v7 = vrot.slane %v4162_v23, 2  ;;  %v857_v31 = vrot.slane %v4118_v3, 2  ;;  %v858_v12 = vrot.slane %v4119_v37, 2  ;;  %v4163_v52 = vld [vmem:[#allocation67_spill] sm:$0xff] }
  0xbd   :  { %v860_v55 = vrot.slane %v4163_v52, 2  ;;  %v862_v56 = vrot.slane %v4120_v27, 2  ;;  %v863_v1 = vrot.slane %v4121_v9, 2  ;;  %v865_v61 = vrot.slane %v4164_v22, 2  ;;  %v4165_v38 = vld [vmem:[#allocation73_spill] sm:$0xff] }
  0xbe   :  { %v867_v51 = vrot.slane %v4122_v18, 2  ;;  %v868_v35 = vrot.slane %v4124_v48, 2  ;;  %v841_v39 = vsel %vm831_vm2, %v838_v14, %v840_v20  ;;  %v844_v23 = vsel %vm831_vm2, %v842_v2, %v843_v33  ;;  %v4166_v2 = vld [vmem:[#allocation76_spill] sm:$0xff]  ;;  %v4173_v28 = vld [vmem:[#allocation93_spill] sm:$0xff] }
  0xbf   :  { %v846_v3 = vsel %vm831_vm2, %v843_v33, %v845_v49  ;;  %v870_v37 = vrot.slane %v4165_v38, 2  ;;  %v849_v52 = vsel %vm831_vm2, %v847_v15, %v848_v44  ;;  %v851_v27 = vsel %vm831_vm2, %v848_v44, %v850_v45  ;;  %v4167_v15 = vld [vmem:[#allocation79_spill] sm:$0xff] }
  0xc0   :  { %v872_v9 = vrot.slane %v4126_v0, 2  ;;  %v873_v22 = vrot.slane %v4128_v29, 2  ;;  %v854_v18 = vsel %vm831_vm2, %v852_v16, %v853_v32  ;;  %v856_v48 = vsel %vm831_vm2, %v853_v32, %v855_v7 }
  0xc1   :  { %v859_v20 = vsel %vm831_vm2, %v857_v31, %v858_v12  ;;  %v861_v14 = vsel %vm831_vm2, %v858_v12, %v860_v55  ;;  %v864_v33 = vsel %vm831_vm2, %v862_v56, %v863_v1  ;;  %v866_v38 = vsel %vm831_vm2, %v863_v1, %v865_v61  ;;  %v4168_v31 = vld [vmem:[#allocation82_spill] sm:$0xff]  ;;  %v4169_v61 = vld [vmem:[#allocation85_spill] sm:$0xff] }
  0xc2   :  { %v869_v49 = vsel %vm831_vm2, %v867_v51, %v868_v35  ;;  %v875_v45 = vrot.slane %v4166_v2, 2  ;;  %v871_v0 = vsel %vm831_vm2, %v868_v35, %v870_v37  ;;  %v877_v29 = vrot.slane %v4130_v8, 2  ;;  %v4170_v35 = vld [vmem:[#allocation88_spill] sm:$0xff]  ;;  %v4171_v2 = vld [vmem:[#allocation21_spill] sm:$0xff] }
  0xc3   :  { %v878_v44 = vrot.slane %v4132_v50, 2  ;;  %v880_v7 = vrot.slane %v4167_v15, 2  ;;  %v874_v16 = vsel %vm831_vm2, %v872_v9, %v873_v22  ;;  %v882_v55 = vrot.slane %v4134_v26, 2 }
  0xc4   :  { %v883_v32 = vrot.slane %v4136_v36, 2  ;;  %v885_v12 = vrot.slane %v4168_v31, 2  ;;  %v887_v56 = vrot.slane %v4138_v19, 2  ;;  %v888_v1 = vrot.slane %v4141_v58, 2  ;;  %v4172_v31 = vld [vmem:[#allocation90_spill] sm:$0xff] }
  0xc5   :  { %v890_v51 = vrot.slane %v4169_v61, 2  ;;  %v892_v8 = vrot.slane %v4143_v63, 2  ;;  %v893_v50 = vrot.slane %v4145_v10, 2  ;;  %v895_v37 = vrot.slane %v4170_v35, 2 }
  0xc6   :  { %v897_v9 = vrot.slane %v4147_v47, 2  ;;  %v898_v26 = vrot.slane %v4149_v57, 2  ;;  %v900_v36 = vrot.slane %v4171_v2, 2  ;;  %v902_v15 = vrot.slane %v4151_v40, 2 }
  0xc7   :  { %v903_v19 = vrot.slane %v4153_v17, 2  ;;  %v905_v58 = vrot.slane %v4172_v31, 2  ;;  %v876_v61 = vsel %vm831_vm2, %v873_v22, %v875_v45  ;;  %v879_v63 = vsel %vm831_vm2, %v877_v29, %v878_v44 }
  0xc8   :  { %v907_v10 = vrot.slane %v4155_v30, 2  ;;  %v908_v35 = vrot.slane %v4157_v42, 2  ;;  %v881_v47 = vsel %vm831_vm2, %v878_v44, %v880_v7  ;;  %v884_v57 = vsel %vm831_vm2, %v882_v55, %v883_v32 }
  0xc9   :  { %v886_v2 = vsel %vm831_vm2, %v883_v32, %v885_v12  ;;  %v910_v40 = vrot.slane %v4173_v28, 2  ;;  %v889_v17 = vsel %vm831_vm2, %v887_v56, %v888_v1  ;;  %v891_v31 = vsel %vm831_vm2, %v888_v1, %v890_v51 }
  0xca   :  { %v894_v22 = vsel %vm831_vm2, %v892_v8, %v893_v50  ;;  %v896_v45 = vsel %vm831_vm2, %v893_v50, %v895_v37  ;;  %v899_v30 = vsel %vm831_vm2, %v897_v9, %v898_v26  ;;  %v901_v42 = vsel %vm831_vm2, %v898_v26, %v900_v36  ;;  %v4186_v50 = vld [vmem:[#allocation68_spill] sm:$0xff]  ;;  %v4187_v9 = vld [vmem:[#allocation69_spill] sm:$0xff]  ;;  %v4188_v36 = vld [vmem:[#allocation71_spill] sm:$0xff] }
  0xcb   :  { %v904_v29 = vsel %vm831_vm2, %v902_v15, %v903_v19  ;;  %v906_v44 = vsel %vm831_vm2, %v903_v19, %v905_v58  ;;  %v909_v7 = vsel %vm831_vm2, %v907_v10, %v908_v35  ;;  %v2822_v28 = vadd.f32 %v2742_v60, %v2637_v11  ;;  %v4189_v19 = vld [vmem:[#allocation72_spill] sm:$0xff]  ;;  %v4191_v10 = vld [vmem:[#allocation75_spill] sm:$0xff] }
  0xcc   :  { %v2826_v55 = vadd.f32 %v2745_v54, %v2641_v43  ;;  %v2830_v32 = vadd.f32 %v2750_v5, %v2645_v25  ;;  %v911_v12 = vsel %vm831_vm2, %v908_v35, %v910_v40  ;;  %v2834_v56 = vadd.f32 %v841_v39, %v2649_v53 }
  0xcd   :  { %v2837_v1 = vadd.f32 %v844_v23, %v2652_v46  ;;  %v2840_v51 = vadd.f32 %v846_v3, %v2655_v4  ;;  %v2843_v11 = vadd.f32 %v849_v52, %v2658_v6  ;;  %v2846_v43 = vadd.f32 %v851_v27, %v2661_v21  ;;  %v4174_v21 = vld [vmem:[#allocation54_spill] sm:$0xff] }
  0xce   :  { %v2849_v25 = vadd.f32 %v854_v18, %v2664_v13  ;;  %v2852_v60 = vadd.f32 %v856_v48, %v2667_v41  ;;  %v2855_v53 = vadd.f32 %v859_v20, %v2670_v59  ;;  %v2858_v46 = vadd.f32 %v861_v14, %v2673_v62  ;;  %v4175_v13 = vld [vmem:[#allocation55_spill] sm:$0xff]  ;;  %v4176_v41 = vld [vmem:[#allocation57_spill] sm:$0xff]  ;;  %v4177_v59 = vld [vmem:[#allocation60_spill] sm:$0xff] }
  0xcf   :  { %v2861_v4 = vadd.f32 %v864_v33, %v2676_v24  ;;  %v2864_v6 = vadd.f32 %v866_v38, %v2679_v34  ;;  %v2867_v54 = vadd.f32 %v869_v49, %v4174_v21  ;;  %v2870_v5 = vadd.f32 %v871_v0, %v4175_v13  ;;  %v4178_v62 = vld [vmem:[#allocation62_spill] sm:$0xff]  ;;  %v4179_v24 = vld [vmem:[#allocation63_spill] sm:$0xff]  ;;  %v4180_v34 = vld [vmem:[#allocation65_spill] sm:$0xff] }
  0xd0   :  { %v2873_v39 = vadd.f32 %v874_v16, %v4176_v41  ;;  %v2876_v23 = vadd.f32 %v876_v61, %v4177_v59  ;;  %v2879_v3 = vadd.f32 %v879_v63, %v4178_v62  ;;  %v2882_v52 = vadd.f32 %v881_v47, %v4179_v24  ;;  %v4181_v18 = vld [vmem:[#allocation2_spill] sm:$0xff]  ;;  %v4182_v20 = vld [vmem:[#allocation4_spill] sm:$0xff]  ;;  %v4183_v33 = vld [vmem:[#allocation5_spill] sm:$0xff] }
  0xd1   :  { %v2885_v27 = vadd.f32 %v884_v57, %v4180_v34  ;;  %v2888_v48 = vadd.f32 %v886_v2, %v4181_v18  ;;  %v2891_v14 = vadd.f32 %v889_v17, %v4182_v20  ;;  %v2894_v38 = vadd.f32 %v891_v31, %v4183_v33  ;;  %v4184_v49 = vld [vmem:[#allocation7_spill] sm:$0xff]  ;;  %v4185_v16 = vld [vmem:[#allocation66_spill] sm:$0xff]  ;;  %v4192_v47 = vld [vmem:[#allocation41_spill] sm:$0xff] }
  0xd2   :  { %v2897_v0 = vadd.f32 %v894_v22, %v4184_v49  ;;  %v2900_v8 = vadd.f32 %v896_v45, %v4185_v16  ;;  %v2903_v37 = vadd.f32 %v899_v30, %v4186_v50  ;;  %v2906_v26 = vadd.f32 %v901_v42, %v4187_v9  ;;  %v4190_v61 = vld [vmem:[#allocation74_spill] sm:$0xff]  ;;  %v4193_v2 = vld [vmem:[#allocation45_spill] sm:$0xff]  ;;  %v4199_v21 = vld [vmem:[#allocation95_spill] sm:$0xff] }
  0xd3   :  { %v2909_v15 = vadd.f32 %v904_v29, %v4188_v36  ;;  %v2912_v58 = vadd.f32 %v906_v44, %v4189_v19  ;;  %v2915_v63 = vadd.f32 %v909_v7, %v4190_v61  ;;  %v2918_v35 = vadd.f32 %v911_v12, %v4191_v10  ;;  %v4194_v17 = vld [vmem:[#allocation53_spill] sm:$0xff]  ;;  %v4195_v22 = vld [vmem:[#allocation58_spill] sm:$0xff]  ;;  %v4201_v62 = vld [vmem:[#allocation96_spill] sm:$0xff] }
  0xd4   :  { %v2922_v57 = vmul.f32 %v4192_v47, %v4192_v47  ;;  %v2926_v40 = vmul.f32 %v4193_v2, %v4193_v2  ;;  %v2930_v31 = vmul.f32 %v4194_v17, %v4194_v17  ;;  %v2934_v45 = vmul.f32 %v4195_v22, %v4195_v22  ;;  %v4196_v30 = vld [vmem:[#allocation25_spill] sm:$0xff]  ;;  %v4198_v7 = vld [vmem:[#allocation94_spill] sm:$0xff]  ;;  %v4203_v20 = vld [vmem:[#allocation59_spill] sm:$0xff] }
  0xd5   :  { %v2938_v42 = vmul.f32 %v4196_v30, %v4196_v30  ;;  %v4197_v29 = vld [vmem:[#allocation37_spill] sm:$0xff]  ;;  %v2946_v12 = vmul.f32 %v4198_v7, %v4198_v7  ;;  %v2950_v13 = vmul.f32 %v4199_v21, %v4199_v21  ;;  %v2958_v24 = vmul.f32 %v4201_v62, %v4201_v62  ;;  %v4204_v49 = vld [vmem:[#allocation8_spill] sm:$0xff]  ;;  %v4206_v36 = vld [vmem:[#allocation10_spill] sm:$0xff] }
  0xd6   :  { %v2942_v44 = vmul.f32 %v4197_v29, %v4197_v29  ;;  %v4200_v41 = vld [vmem:[#allocation49_spill] sm:$0xff]  ;;  %v2966_v33 = vmul.f32 %v4203_v20, %v4203_v20  ;;  %v2970_v16 = vmul.f32 %v4204_v49, %v4204_v49  ;;  %v2978_v19 = vmul.f32 %v4206_v36, %v4206_v36  ;;  %v4207_v61 = vld [vmem:[#allocation11_spill] sm:$0xff]  ;;  %v4208_v47 = vld [vmem:[#allocation12_spill] sm:$0xff] }
  0xd7   :  { %v2954_v59 = vmul.f32 %v4200_v41, %v4200_v41  ;;  %v4202_v34 = vld [vmem:[#allocation97_spill] sm:$0xff]  ;;  %v2982_v10 = vmul.f32 %v4207_v61, %v4207_v61  ;;  %v2986_v2 = vmul.f32 %v4208_v47, %v4208_v47  ;;  %v4211_v30 = vld [vmem:[#allocation14_spill] sm:$0xff]  ;;  %v4213_v7 = vld [vmem:[#allocation15_spill] sm:$0xff] }
  0xd8   :  { %v2962_v18 = vmul.f32 %v4202_v34, %v4202_v34  ;;  %v4205_v50 = vld [vmem:[#allocation9_spill] sm:$0xff]  ;;  %v2994_v29 = vmul.f32 %v4211_v30, %v4211_v30  ;;  %v2998_v21 = vmul.f32 %v4213_v7, %v4213_v7  ;;  %v4215_v41 = vld [vmem:[#allocation16_spill] sm:$0xff]  ;;  %v4217_v34 = vld [vmem:[#allocation18_spill] sm:$0xff] }
  0xd9   :  { %v2974_v9 = vmul.f32 %v4205_v50, %v4205_v50  ;;  %v4209_v17 = vld [vmem:[#allocation13_spill] sm:$0xff]  ;;  %v3002_v62 = vmul.f32 %v4215_v41, %v4215_v41  ;;  %v3006_v20 = vmul.f32 %v4217_v34, %v4217_v34  ;;  %v4219_v49 = vld [vmem:[#allocation19_spill] sm:$0xff]  ;;  %v4221_v36 = vld [vmem:[#allocation20_spill] sm:$0xff] }
  0xda   :  { %v2990_v22 = vmul.f32 %v4209_v17, %v4209_v17  ;;  %4212 = vst [vmem:[#allocation78_spill] sm:$0xff] %v2994_v29  ;;  %4214 = vst [vmem:[#allocation80_spill] sm:$0xff] %v2998_v21  ;;  %v3010_v50 = vmul.f32 %v4219_v49, %v4219_v49  ;;  %v3014_v61 = vmul.f32 %v4221_v36, %v4221_v36  ;;  %v4223_v47 = vld [vmem:[#allocation22_spill] sm:$0xff]  ;;  %v4225_v30 = vld [vmem:[#allocation23_spill] sm:$0xff] }
  0xdb   :  { %4216 = vst [vmem:[#allocation81_spill] sm:$0xff] %v3002_v62  ;;  %4218 = vst [vmem:[#allocation83_spill] sm:$0xff] %v3006_v20  ;;  %v3018_v17 = vmul.f32 %v4223_v47, %v4223_v47  ;;  %v3022_v7 = vmul.f32 %v4225_v30, %v4225_v30  ;;  %v4227_v41 = vld [vmem:[#allocation24_spill] sm:$0xff]  ;;  %v4229_v62 = vld [vmem:[#allocation26_spill] sm:$0xff] }
  0xdc   :  { %4210 = vst [vmem:[#allocation77_spill] sm:$0xff] %v2990_v22  ;;  %4220 = vst [vmem:[#allocation56_spill] sm:$0xff] %v3010_v50  ;;  %v3026_v34 = vmul.f32 %v4227_v41, %v4227_v41  ;;  %v3030_v49 = vmul.f32 %v4229_v62, %v4229_v62  ;;  %v4231_v50 = vld [vmem:[#allocation27_spill] sm:$0xff] }
  0xdd   :  { %4222 = vst [vmem:[#allocation84_spill] sm:$0xff] %v3014_v61  ;;  %4224 = vst [vmem:[#allocation86_spill] sm:$0xff] %v3018_v17  ;;  %v3034_v36 = vmul.f32 %v4231_v50, %v4231_v50  ;;  %v4233_v61 = vld [vmem:[#allocation28_spill] sm:$0xff]  ;;  %v4235_v17 = vld [vmem:[#allocation30_spill] sm:$0xff] }
  0xde   :  { %4226 = vst [vmem:[#allocation87_spill] sm:$0xff] %v3022_v7  ;;  %4228 = vst [vmem:[#allocation89_spill] sm:$0xff] %v3026_v34  ;;  %v3038_v47 = vmul.f32 %v4233_v61, %v4233_v61  ;;  %v3042_v30 = vmul.f32 %v4235_v17, %v4235_v17  ;;  %v4237_v7 = vld [vmem:[#allocation31_spill] sm:$0xff]  ;;  %v4239_v34 = vld [vmem:[#allocation32_spill] sm:$0xff] }
  0xdf   :  { %4230 = vst [vmem:[#allocation17_spill] sm:$0xff] %v3030_v49  ;;  %4232 = vst [vmem:[#allocation29_spill] sm:$0xff] %v3034_v36  ;;  %v3046_v41 = vmul.f32 %v4237_v7, %v4237_v7  ;;  %v3050_v62 = vmul.f32 %v4239_v34, %v4239_v34  ;;  %v4241_v49 = vld [vmem:[#allocation34_spill] sm:$0xff]  ;;  %v4243_v36 = vld [vmem:[#allocation35_spill] sm:$0xff] }
  0xe0   :  { %4234 = vst [vmem:[#allocation33_spill] sm:$0xff] %v3038_v47  ;;  %4236 = vst [vmem:[#allocation91_spill] sm:$0xff] %v3042_v30  ;;  %v3054_v50 = vmul.f32 %v4241_v49, %v4241_v49  ;;  %v3058_v61 = vmul.f32 %v4243_v36, %v4243_v36  ;;  %v4245_v47 = vld [vmem:[#allocation36_spill] sm:$0xff]  ;;  %v4247_v30 = vld [vmem:[#allocation38_spill] sm:$0xff] }
  0xe1   :  { %4238 = vst [vmem:[#allocation92_spill] sm:$0xff] %v3046_v41  ;;  %4240 = vst [vmem:[#allocation61_spill] sm:$0xff] %v3050_v62  ;;  %v3062_v17 = vmul.f32 %v4245_v47, %v4245_v47  ;;  %v3066_v7 = vmul.f32 %v4247_v30, %v4247_v30  ;;  %v4249_v41 = vld [vmem:[#allocation39_spill] sm:$0xff]  ;;  %v4251_v62 = vld [vmem:[#allocation40_spill] sm:$0xff] }
  0xe2   :  { %4242 = vst [vmem:[#allocation64_spill] sm:$0xff] %v3054_v50  ;;  %4244 = vst [vmem:[#allocation3_spill] sm:$0xff] %v3058_v61  ;;  %v3070_v34 = vmul.f32 %v4249_v41, %v4249_v41  ;;  %v3074_v49 = vmul.f32 %v4251_v62, %v4251_v62  ;;  %v4253_v50 = vld [vmem:[#allocation42_spill] sm:$0xff]  ;;  %v4255_v61 = vld [vmem:[#allocation43_spill] sm:$0xff] }
  0xe3   :  { %4246 = vst [vmem:[#allocation6_spill] sm:$0xff] %v3062_v17  ;;  %4248 = vst [vmem:[#allocation67_spill] sm:$0xff] %v3066_v7  ;;  %v3078_v36 = vmul.f32 %v4253_v50, %v4253_v50  ;;  %v3082_v47 = vmul.f32 %v4255_v61, %v4255_v61  ;;  %v4257_v17 = vld [vmem:[#allocation44_spill] sm:$0xff]  ;;  %v4259_v7 = vld [vmem:[#allocation46_spill] sm:$0xff] }
  0xe4   :  { %4250 = vst [vmem:[#allocation70_spill] sm:$0xff] %v3070_v34  ;;  %4252 = vst [vmem:[#allocation73_spill] sm:$0xff] %v3074_v49  ;;  %v3086_v30 = vmul.f32 %v4257_v17, %v4257_v17  ;;  %v3090_v41 = vmul.f32 %v4259_v7, %v4259_v7  ;;  %v4261_v34 = vld [vmem:[#allocation47_spill] sm:$0xff]  ;;  %v4263_v49 = vld [vmem:[#allocation48_spill] sm:$0xff] }
  0xe5   :  { %4254 = vst [vmem:[#allocation76_spill] sm:$0xff] %v3078_v36  ;;  %4256 = vst [vmem:[#allocation79_spill] sm:$0xff] %v3082_v47  ;;  %v3094_v62 = vmul.f32 %v4261_v34, %v4261_v34  ;;  %v3098_v50 = vmul.f32 %v4263_v49, %v4263_v49  ;;  %v4265_v36 = vld [vmem:[#allocation50_spill] sm:$0xff]  ;;  %v4267_v47 = vld [vmem:[#allocation51_spill] sm:$0xff]  ;;  %v3114_v34 = vmul.f32 %v2822_v28, %v2822_v28 }
  0xe6   :  { %4258 = vst [vmem:[#allocation82_spill] sm:$0xff] %v3086_v30  ;;  %4260 = vst [vmem:[#allocation85_spill] sm:$0xff] %v3090_v41  ;;  %v3102_v61 = vmul.f32 %v4265_v36, %v4265_v36  ;;  %v3106_v17 = vmul.f32 %v4267_v47, %v4267_v47  ;;  %v4269_v30 = vld [vmem:[#allocation52_spill] sm:$0xff]  ;;  %v3118_v49 = vmul.f32 %v2826_v55, %v2826_v55 }
  0xe7   :  { %4262 = vst [vmem:[#allocation88_spill] sm:$0xff] %v3094_v62  ;;  %4264 = vst [vmem:[#allocation21_spill] sm:$0xff] %v3098_v50  ;;  %v3110_v7 = vmul.f32 %v4269_v30, %v4269_v30  ;;  %v3122_v36 = vmul.f32 %v2830_v32, %v2830_v32  ;;  %v3126_v47 = vmul.f32 %v2834_v56, %v2834_v56 }
  0xe8   :  { %4266 = vst [vmem:[#allocation90_spill] sm:$0xff] %v3102_v61  ;;  %4268 = vst [vmem:[#allocation93_spill] sm:$0xff] %v3106_v17  ;;  %v3130_v30 = vmul.f32 %v2837_v1, %v2837_v1  ;;  %v3134_v28 = vmul.f32 %v2840_v51, %v2840_v51  ;;  %v3138_v55 = vmul.f32 %v2843_v11, %v2843_v11 }
  0xe9   :  { %4270 = vst [vmem:[#allocation54_spill] sm:$0xff] %v3110_v7  ;;  %v3142_v32 = vmul.f32 %v2846_v43, %v2846_v43  ;;  %v3146_v56 = vmul.f32 %v2849_v25, %v2849_v25  ;;  %v3150_v1 = vmul.f32 %v2852_v60, %v2852_v60  ;;  %v3154_v51 = vmul.f32 %v2855_v53, %v2855_v53 }
  0xea   :  { %v3158_v11 = vmul.f32 %v2858_v46, %v2858_v46  ;;  %v3162_v43 = vmul.f32 %v2861_v4, %v2861_v4  ;;  %v3166_v25 = vmul.f32 %v2864_v6, %v2864_v6  ;;  %v3170_v60 = vmul.f32 %v2867_v54, %v2867_v54 }
  0xeb   :  { %v3174_v53 = vmul.f32 %v2870_v5, %v2870_v5  ;;  %v3178_v46 = vmul.f32 %v2873_v39, %v2873_v39  ;;  %v3182_v4 = vmul.f32 %v2876_v23, %v2876_v23  ;;  %v3186_v6 = vmul.f32 %v2879_v3, %v2879_v3 }
  0xec   :  { %4271 = vst [vmem:[#allocation55_spill] sm:$0xff] %v3158_v11  ;;  %4272 = vst [vmem:[#allocation57_spill] sm:$0xff] %v3162_v43  ;;  %v3190_v54 = vmul.f32 %v2882_v52, %v2882_v52  ;;  %v3194_v5 = vmul.f32 %v2885_v27, %v2885_v27  ;;  %v3198_v39 = vmul.f32 %v2888_v48, %v2888_v48  ;;  %v1088_v7 = vrot.slane %v3114_v34, 6 }
  0xed   :  { %4273 = vst [vmem:[#allocation60_spill] sm:$0xff] %v3166_v25  ;;  %4274 = vst [vmem:[#allocation62_spill] sm:$0xff] %v3174_v53  ;;  %v3202_v23 = vmul.f32 %v2891_v14, %v2891_v14  ;;  %v3206_v3 = vmul.f32 %v2894_v38, %v2894_v38  ;;  %v3210_v52 = vmul.f32 %v2897_v0, %v2897_v0  ;;  %v1091_v17 = vrot.slane %v3122_v36, 6 }
  0xee   :  { %4275 = vst [vmem:[#allocation63_spill] sm:$0xff] %v3190_v54  ;;  %4276 = vst [vmem:[#allocation65_spill] sm:$0xff] %v3198_v39  ;;  %v3214_v27 = vmul.f32 %v2900_v8, %v2900_v8  ;;  %v3218_v48 = vmul.f32 %v2903_v37, %v2903_v37  ;;  %v3222_v14 = vmul.f32 %v2906_v26, %v2906_v26  ;;  %v1089_v8 = vrot.slane %v3118_v49, 6 }
  0xef   :  { %v3226_v38 = vmul.f32 %v2909_v15, %v2909_v15  ;;  %v3230_v0 = vmul.f32 %v2912_v58, %v2912_v58  ;;  %v1092_v37 = vrot.slane %v3126_v47, 6  ;;  %v1094_v50 = vrot.slane %v3130_v30, 6 }
  0xf0   :  { %v1095_v26 = vrot.slane %v3134_v28, 6  ;;  %v1097_v62 = vrot.slane %v3138_v55, 6  ;;  %v1098_v15 = vrot.slane %v3142_v32, 6  ;;  %v1100_v61 = vrot.slane %v3146_v56, 6 }
  0xf1   :  { %v1103_v34 = vrot.slane %v3154_v51, 6  ;;  %v3250_v55 = vmul.f32 %v2915_v63, %v2915_v63  ;;  %v3254_v32 = vmul.f32 %v2918_v35, %v2918_v35  ;;  %v1090_v56 = vsel %vm397_vm0, %v1088_v7, %v1089_v8 }
  0xf2   :  { %v1093_v51 = vsel %vm397_vm0, %v1091_v17, %v1092_v37  ;;  %v1096_v36 = vsel %vm397_vm0, %v1094_v50, %v1095_v26  ;;  %v1099_v47 = vsel %vm397_vm0, %v1097_v62, %v1098_v15  ;;  %v4277_v41 = vrot.slane %v3150_v1, 6 }
  0xf3   :  { %v4278_v20 = vrot.slane %v3158_v11, 6  ;;  %v4279_v30 = vrot.slane %v3166_v25, 6  ;;  %v4280_v28 = vrot.slane %v3162_v43, 6  ;;  %v4281_v63 = vrot.slane %v3174_v53, 6 }
  0xf4   :  { %v1102_v21 = vsel %vm397_vm0, %v1100_v61, %v4277_v41  ;;  %v4282_v58 = vrot.slane %v3170_v60, 6  ;;  %v4283_v53 = vrot.slane %v3182_v4, 6  ;;  %v4285_v29 = vrot.slane %v3190_v54, 6 }
  0xf5   :  { %v1105_v22 = vsel %vm397_vm0, %v1103_v34, %v4278_v20  ;;  %v1108_v49 = vsel %vm397_vm0, %v4280_v28, %v4279_v30  ;;  %v4286_v11 = vrot.slane %v3186_v6, 6  ;;  %v4287_v25 = vrot.slane %v3198_v39, 6 }
  0xf6   :  { %v3282_v35 = vsel %vm397_vm0, %v4282_v58, %v4281_v63  ;;  %v4284_v58 = vrot.slane %v3178_v46, 6  ;;  %v4288_v30 = vrot.slane %v3194_v5, 6  ;;  %v1184_v43 = vadd.f32 %v1088_v7, %v2922_v57 }
  0xf7   :  { %v3304_v20 = vsel %vm397_vm0, %v4286_v11, %v4285_v29  ;;  %v1185_v41 = vadd.f32 %v1090_v56, %v2926_v40  ;;  %v1190_v54 = vadd.f32 %v1094_v50, %v2946_v12  ;;  %v4289_v29 = vrot.slane %v3206_v3, 6 }
  0xf8   :  { %v3297_v63 = vsel %vm397_vm0, %v4284_v58, %v4283_v53  ;;  %v3311_v28 = vsel %vm397_vm0, %v4288_v30, %v4287_v25  ;;  %v1187_v53 = vadd.f32 %v1091_v17, %v2934_v45  ;;  %v1188_v58 = vadd.f32 %v1093_v51, %v2938_v42 }
  0xf9   :  { %v4290_v11 = vrot.slane %v3202_v23, 6  ;;  %v4291_v25 = vrot.slane %v3214_v27, 6  ;;  %v4292_v30 = vrot.slane %v3210_v52, 6  ;;  %v4293_v42 = vrot.slane %v3222_v14, 6 }
  0xfa   :  { %v4294_v12 = vrot.slane %v3218_v48, 6  ;;  %v4295_v17 = vrot.slane %v3230_v0, 6  ;;  %v4296_v7 = vrot.slane %v3226_v38, 6  ;;  %v1186_v51 = vadd.f32 %v1089_v8, %v2930_v31 }
  0xfb   :  { %v3323_v39 = vsel %vm397_vm0, %v4290_v11, %v4289_v29  ;;  %v3330_v57 = vsel %vm397_vm0, %v4292_v30, %v4291_v25  ;;  %v1193_v29 = vadd.f32 %v1097_v62, %v2958_v24  ;;  %v1189_v11 = vadd.f32 %v1092_v37, %v2942_v44 }
  0xfc   :  { %v3339_v50 = vsel %vm397_vm0, %v4294_v12, %v4293_v42  ;;  %v3346_v56 = vsel %vm397_vm0, %v4296_v7, %v4295_v17  ;;  %v1191_v25 = vadd.f32 %v1096_v36, %v2950_v13  ;;  %v1196_v30 = vadd.f32 %v1100_v61, %v2970_v16 }
  0xfd   :  { %v1233_v42 = vsel %vm1232_vm3, %v1184_v43, 0.0  ;;  %v1234_v12 = vsel %vm1232_vm3, %v1187_v53, 0.0  ;;  %v1236_v40 = vsel %vm1232_vm3, %v1190_v54, 0.0  ;;  %v1264_v45 = vadd.f32 %v1188_v58, %v1185_v41  ;;  %v4304_v58 = vld [vmem:[#allocation55_spill] sm:$0xff] }
  0xfe   :  { %v4297_v17 = vrot.slane %v3254_v32, 6  ;;  %v4298_v31 = vrot.slane %v3250_v55, 6  ;;  %v1192_v44 = vadd.f32 %v1095_v26, %v2954_v59  ;;  %v1194_v13 = vadd.f32 %v1099_v47, %v2962_v18  ;;  %v4300_v26 = vld [vmem:[#allocation78_spill] sm:$0xff]  ;;  %v4301_v18 = vld [vmem:[#allocation57_spill] sm:$0xff] }
  0xff   :  { %v1235_v16 = vadd.f32 %v1234_v12, %v1233_v42  ;;  %v1195_v62 = vadd.f32 %v1098_v15, %v2966_v33  ;;  %v1199_v61 = vadd.f32 %v1103_v34, %v2982_v10  ;;  %v1238_v43 = vsel %vm1232_vm3, %v1193_v29, 0.0  ;;  %v4303_v34 = vld [vmem:[#allocation77_spill] sm:$0xff]  ;;  %v4310_v42 = vld [vmem:[#allocation60_spill] sm:$0xff] }
 0x100   :  { %v3361_v24 = vsel %vm397_vm0, %v4298_v31, %v4297_v17  ;;  %v1279_v54 = vsel %vm397_vm0, %v1186_v51, 0.0  ;;  %v1197_v8 = vadd.f32 %v1102_v21, %v2974_v9  ;;  %v4299_v37 = vrot.slane %v3150_v1, 6  ;;  %v4306_v1 = vld [vmem:[#allocation83_spill] sm:$0xff] }
 0x101   :  { %v1200_v41 = vadd.f32 %v1105_v22, %v2986_v2  ;;  %v1237_v59 = vadd.f32 %v1236_v40, %v1235_v16  ;;  %v4302_v47 = vrot.slane %v4301_v18, 6  ;;  %v1240_v33 = vsel %vm1232_vm3, %v1196_v30, 0.0 }
 0x102   :  { %v1198_v36 = vadd.f32 %v4299_v37, %v2978_v19  ;;  %v1265_v10 = vadd.f32 %v1264_v45, %v1191_v25  ;;  %v1280_v15 = vsel %vm397_vm0, %v1189_v11, 0.0  ;;  %v4305_v7 = vrot.slane %v4304_v58, 6  ;;  %v4308_v45 = vld [vmem:[#allocation80_spill] sm:$0xff]  ;;  %v4309_v11 = vld [vmem:[#allocation81_spill] sm:$0xff] }
 0x103   :  { %v1202_v53 = vadd.f32 %v4302_v47, %v4300_v26  ;;  %v1239_v21 = vadd.f32 %v1238_v43, %v1237_v59  ;;  %v1281_v51 = vadd.f32 %v1280_v15, %v1279_v54  ;;  %v1282_v19 = vsel %vm397_vm0, %v1192_v44, 0.0  ;;  %v4312_v43 = vld [vmem:[#allocation86_spill] sm:$0xff]  ;;  %v4315_v59 = vld [vmem:[#allocation84_spill] sm:$0xff] }
 0x104   :  { %v1201_v9 = vadd.f32 %v4305_v7, %v4303_v34  ;;  %v4307_v2 = vrot.slane %v3170_v60, 6  ;;  %v1242_v40 = vsel %vm1232_vm3, %v1199_v61, 0.0  ;;  %v1266_v29 = vadd.f32 %v1265_v10, %v1194_v13  ;;  %v4314_v13 = vld [vmem:[#allocation56_spill] sm:$0xff]  ;;  %v4321_v7 = vld [vmem:[#allocation89_spill] sm:$0xff] }
 0x105   :  { %v1284_v30 = vsel %vm397_vm0, %v1195_v62, 0.0  ;;  %v1203_v25 = vadd.f32 %v1108_v49, %v4308_v45  ;;  %v4311_v12 = vrot.slane %v4310_v42, 6  ;;  %v1241_v31 = vadd.f32 %v1240_v33, %v1239_v21  ;;  %v4316_v49 = vld [vmem:[#allocation62_spill] sm:$0xff]  ;;  %v4318_v33 = vld [vmem:[#allocation17_spill] sm:$0xff] }
 0x106   :  { %v1205_v22 = vadd.f32 %v4307_v2, %v4306_v1  ;;  %v1283_v16 = vadd.f32 %v1282_v19, %v1281_v51  ;;  %v4313_v44 = vrot.slane %v3178_v46, 6  ;;  %v1244_v60 = vsel %vm1232_vm3, %v1202_v53, 0.0  ;;  %v4320_v53 = vld [vmem:[#allocation87_spill] sm:$0xff] }
 0x107   :  { %v1204_v17 = vadd.f32 %v4311_v12, %v4309_v11  ;;  %v1267_v37 = vadd.f32 %v1266_v29, %v1197_v8  ;;  %v1286_v61 = vsel %vm397_vm0, %v1198_v36, 0.0  ;;  %v1206_v62 = vadd.f32 %v3282_v35, %v4314_v13  ;;  %v4323_v1 = vld [vmem:[#allocation91_spill] sm:$0xff]  ;;  %v4329_v12 = vld [vmem:[#allocation64_spill] sm:$0xff] }
 0x108   :  { %v1208_v54 = vadd.f32 %v4313_v44, %v4312_v43  ;;  %v4317_v26 = vrot.slane %v4316_v49, 6  ;;  %v1243_v47 = vadd.f32 %v1242_v40, %v1241_v31  ;;  %v1285_v10 = vadd.f32 %v1284_v30, %v1283_v16  ;;  %v4326_v30 = vld [vmem:[#allocation33_spill] sm:$0xff]  ;;  %v4331_v44 = vld [vmem:[#allocation92_spill] sm:$0xff] }
 0x109   :  { %v4319_v15 = vrot.slane %v3186_v6, 6  ;;  %v1246_v46 = vsel %vm1232_vm3, %v1205_v22, 0.0  ;;  %v1268_v58 = vadd.f32 %v1267_v37, %v1200_v41  ;;  %v1288_v8 = vsel %vm397_vm0, %v1201_v9, 0.0  ;;  %v4325_v22 = vld [vmem:[#allocation29_spill] sm:$0xff] }
 0x10a   :  { %v1207_v18 = vadd.f32 %v4317_v26, %v4315_v59  ;;  %v1209_v36 = vadd.f32 %v3297_v63, %v4320_v53  ;;  %v4322_v35 = vrot.slane %v3182_v4, 6  ;;  %v1245_v51 = vadd.f32 %v1244_v60, %v1243_v47  ;;  %v4327_v63 = vld [vmem:[#allocation63_spill] sm:$0xff] }
 0x10b   :  { %v1211_v34 = vadd.f32 %v4319_v15, %v4318_v33  ;;  %v1287_v19 = vadd.f32 %v1286_v61, %v1285_v10  ;;  %v4324_v2 = vrot.slane %v3194_v5, 6  ;;  %v1248_v6 = vsel %vm1232_vm3, %v1208_v54, 0.0  ;;  %v4332_v54 = vld [vmem:[#allocation61_spill] sm:$0xff]  ;;  %v4335_v59 = vld [vmem:[#allocation67_spill] sm:$0xff]  ;;  %v4338_v33 = vld [vmem:[#allocation6_spill] sm:$0xff] }
 0x10c   :  { %v1210_v21 = vadd.f32 %v4322_v35, %v4321_v7  ;;  %v1269_v29 = vadd.f32 %v1268_v58, %v1203_v25  ;;  %v1290_v41 = vsel %vm397_vm0, %v1204_v17, 0.0  ;;  %v1212_v9 = vadd.f32 %v3304_v20, %v4325_v22  ;;  %v4333_v20 = vld [vmem:[#allocation65_spill] sm:$0xff]  ;;  %v4337_v10 = vld [vmem:[#allocation3_spill] sm:$0xff]  ;;  %v4340_v58 = vld [vmem:[#allocation76_spill] sm:$0xff] }
 0x10d   :  { %v1214_v40 = vadd.f32 %v4324_v2, %v4323_v1  ;;  %v4328_v45 = vrot.slane %v4327_v63, 6  ;;  %v1247_v4 = vadd.f32 %v1246_v46, %v1245_v51  ;;  %v1289_v42 = vadd.f32 %v1288_v8, %v1287_v19  ;;  %v4342_v35 = vld [vmem:[#allocation70_spill] sm:$0xff]  ;;  %v4343_v51 = vld [vmem:[#allocation73_spill] sm:$0xff]  ;;  %v4347_v22 = vld [vmem:[#allocation79_spill] sm:$0xff] }
 0x10e   :  { %v4330_v31 = vrot.slane %v3202_v23, 6  ;;  %v1250_v5 = vsel %vm1232_vm3, %v1211_v34, 0.0  ;;  %v1270_v43 = vadd.f32 %v1269_v29, %v1206_v62  ;;  %v1292_v25 = vsel %vm397_vm0, %v1207_v18, 0.0  ;;  %v4345_v2 = vld [vmem:[#allocation85_spill] sm:$0xff] }
 0x10f   :  { %v1213_v11 = vadd.f32 %v4328_v45, %v4326_v30  ;;  %v1215_v17 = vadd.f32 %v3311_v28, %v4331_v44  ;;  %v4334_v60 = vrot.slane %v4333_v20, 6  ;;  %v1249_v61 = vadd.f32 %v1248_v6, %v1247_v4  ;;  %v4348_v30 = vld [vmem:[#allocation82_spill] sm:$0xff]  ;;  %v4355_v20 = vld [vmem:[#allocation93_spill] sm:$0xff] }
 0x110   :  { %v1217_v16 = vadd.f32 %v4330_v31, %v4329_v12  ;;  %v1291_v13 = vadd.f32 %v1290_v41, %v1289_v42  ;;  %v4336_v49 = vrot.slane %v3210_v52, 6  ;;  %v1252_v23 = vsel %vm1232_vm3, %v1214_v40, 0.0 }
 0x111   :  { %v1216_v37 = vadd.f32 %v4334_v60, %v4332_v54  ;;  %v1271_v47 = vadd.f32 %v1270_v43, %v1209_v36  ;;  %v1294_v62 = vsel %vm397_vm0, %v1210_v21, 0.0  ;;  %v1218_v18 = vadd.f32 %v3323_v39, %v4337_v10 }
 0x112   :  { %v1220_v26 = vadd.f32 %v4336_v49, %v4335_v59  ;;  %v4339_v28 = vrot.slane %v3206_v3, 6  ;;  %v1251_v34 = vadd.f32 %v1250_v5, %v1249_v61  ;;  %v1293_v46 = vadd.f32 %v1292_v25, %v1291_v13  ;;  %v4353_v25 = vld [vmem:[#allocation21_spill] sm:$0xff]  ;;  %v4356_v13 = vld [vmem:[#allocation54_spill] sm:$0xff] }
 0x113   :  { %v4341_v8 = vrot.slane %v3218_v48, 6  ;;  %v1254_v52 = vsel %vm1232_vm3, %v1217_v16, 0.0  ;;  %v1272_v7 = vadd.f32 %v1271_v47, %v1212_v9  ;;  %v1296_v36 = vsel %vm397_vm0, %v1213_v11, 0.0  ;;  %v4350_v11 = vld [vmem:[#allocation90_spill] sm:$0xff]  ;;  %v4352_v16 = vld [vmem:[#allocation88_spill] sm:$0xff] }
 0x114   :  { %v1219_v15 = vadd.f32 %v4339_v28, %v4338_v33  ;;  %v1221_v21 = vadd.f32 %v3330_v57, %v4342_v35  ;;  %v4344_v39 = vrot.slane %v3214_v27, 6  ;;  %v1253_v3 = vadd.f32 %v1252_v23, %v1251_v34 }
 0x115   :  { %v1223_v53 = vadd.f32 %v4341_v8, %v4340_v58  ;;  %v1295_v1 = vadd.f32 %v1294_v62, %v1293_v46  ;;  %v4346_v40 = vrot.slane %v3226_v38, 6  ;;  %v1256_v48 = vsel %vm1232_vm3, %v1220_v26, 0.0 }
 0x116   :  { %v1222_v19 = vadd.f32 %v4344_v39, %v4343_v51  ;;  %v1273_v29 = vadd.f32 %v1272_v7, %v1215_v17  ;;  %v1298_v41 = vsel %vm397_vm0, %v1216_v37, 0.0  ;;  %v1224_v9 = vadd.f32 %v3339_v50, %v4347_v22 }
 0x117   :  { %v1226_v6 = vadd.f32 %v4346_v40, %v4345_v2  ;;  %v4349_v57 = vrot.slane %v3222_v14, 6  ;;  %v1255_v27 = vadd.f32 %v1254_v52, %v1253_v3  ;;  %v1297_v45 = vadd.f32 %v1296_v36, %v1295_v1 }
 0x118   :  { %v4351_v4 = vrot.slane %v3250_v55, 6  ;;  %v1258_v38 = vsel %vm1232_vm3, %v1223_v53, 0.0  ;;  %v1274_v12 = vadd.f32 %v1273_v29, %v1218_v18  ;;  %v1300_v31 = vsel %vm397_vm0, %v1219_v15, 0.0 }
 0x119   :  { %v1225_v63 = vadd.f32 %v4349_v57, %v4348_v30  ;;  %v1227_v5 = vadd.f32 %v3346_v56, %v4352_v16  ;;  %v1257_v43 = vadd.f32 %v1256_v48, %v1255_v27  ;;  %v1299_v50 = vadd.f32 %v1298_v41, %v1297_v45 }
 0x11a   :  { %v1229_v42 = vadd.f32 %v4351_v4, %v4350_v11  ;;  %v4354_v14 = vrot.slane %v3230_v0, 6  ;;  %v1260_v17 = vsel %vm1232_vm3, %v1226_v6, 0.0  ;;  %v1275_v54 = vadd.f32 %v1274_v12, %v1221_v21 }
 0x11b   :  { %v1302_v55 = vsel %vm397_vm0, %v1222_v19, 0.0  ;;  %v1230_v60 = vadd.f32 %v3361_v24, %v4355_v20  ;;  %v1259_v37 = vadd.f32 %v1258_v38, %v1257_v43  ;;  %v1301_v61 = vadd.f32 %v1300_v31, %v1299_v50 }
 0x11c   :  { %v1228_v44 = vadd.f32 %v4354_v14, %v4353_v25  ;;  %v4357_v59 = vrot.slane %v3254_v32, 6  ;;  %v1262_v49 = vsel %vm1232_vm3, %v1229_v42, 0.0  ;;  %v1276_v26 = vadd.f32 %v1275_v54, %v1224_v9 }
 0x11d   :  { %v1304_v0 = vsel %vm397_vm0, %v1225_v63, 0.0  ;;  %v1261_v23 = vadd.f32 %v1260_v17, %v1259_v37  ;;  %v1303_v47 = vadd.f32 %v1302_v55, %v1301_v61 }
 0x11e   :  { %v1231_v56 = vadd.f32 %v4357_v59, %v4356_v13  ;;  %v1277_v62 = vadd.f32 %v1276_v26, %v1227_v5  ;;  %v1306_v10 = vsel %vm397_vm0, %v1228_v44, 0.0 }
 0x11f   :  { %v1263_v18 = vadd.f32 %v1262_v49, %v1261_v23  ;;  %v1305_v33 = vadd.f32 %v1304_v0, %v1303_v47 }
 0x120   :  { %v1278_v28 = vadd.f32 %v1277_v62, %v1230_v60  ;;  %v1308_v24 = vsel %vm397_vm0, %v1231_v56, 0.0 }
 0x121   :  { %v1307_v15 = vadd.f32 %v1306_v10, %v1305_v33  ;;  %1310 = vst [vmem:[%s3494_s2 - $0x2] sm:$0xfc] %v1263_v18 }
 0x122   :  { %1311 = vst [vmem:[%s3494_s2 + $0x6] sm:$0xff] %v1278_v28 }
 0x123   :  { %v1309_v32 = vadd.f32 %v1308_v24, %v1307_v15 }
 0x125   :  { %1312 = vst [vmem:[%s3494_s2 + $0xe] sm:$0x3] %v1309_v32 }

</bundles_post_ra>
